<compile_context>
chip_gen: v7x
topology: tpu7x:2x2x1
jax: 0.10.0
libtpu: 0.0.40
codegen_flags: <defaults>
</compile_context>

<pallas_src>
import jax
import jax.numpy as jnp
from jax.experimental import pallas as pl
from jax.experimental.pallas import tpu as pltpu

EPS = 1e-5  # nn.BatchNorm2d default


def _full_spec(shape):
    nd = len(shape)
    return pl.BlockSpec(shape, lambda i, _nd=nd: (0,) * _nd)


def _build_banded(w9, W, C):
    """(9, Cin, Cout) tap weights (t = dy*3 + dx) -> (3*W*C, W*C) banded weight.

    Wband[dy*WC + wi*C + ci, wo*C + co] = w[dy, wi-wo+1, ci, co] if wi-wo+1 in
    {0,1,2} else 0 (the zero blocks implement the W-boundary zero padding)."""
    WC = W * C
    w_k = w9.reshape(3, 3, C, C)                       # (dy, dx, ci, co)
    wi = jnp.arange(W)[:, None]
    wo = jnp.arange(W)[None, :]
    dx = wi - wo + 1                                   # (W, W)
    valid = ((dx >= 0) & (dx <= 2)).astype(w9.dtype)
    dx_c = jnp.clip(dx, 0, 2)
    sel = w_k[:, dx_c]                                 # (dy, wi, wo, ci, co)
    sel = sel * valid[None, :, :, None, None]
    wb = jnp.transpose(sel, (0, 1, 3, 2, 4))           # (dy, wi, ci, wo, co)
    return wb.reshape(3 * WC, WC)


def _make_dblock_kernel(N, H, W, C, num_res):
    NH = N * H                 # lane-dense rows
    WC = W * C                 # lane-dense row width
    inv_M = 1.0 / (N * H * W)  # BN reduction size (per channel)

    def kernel(x_ref, wb_ref, g_ref, b_ref, fold_ref, o_ref, xpad_ref):
        # Zero the H-padded scratch once; only the interior rows are ever
        # rewritten, so the 1-row halo stays zero for every conv in the block.
        xpad_ref[...] = jnp.zeros_like(xpad_ref)

        ones_row = jnp.ones((1, NH), jnp.float32)      # hoisted (reused by all BNs)
        fold = fold_ref[...]                           # (WC, WC) block-eye, f32

        h_rows = x_ref[...].astype(jnp.float32)        # (NH, WC) lane-dense residual

        def conv_bn(h_in, wband, gamma_row, beta_row, relu):
            # ---- in-kernel H-only zero padding (lane-dense scratch, bf16) ----
            xpad_ref[:, 1:H + 1, :] = h_in.reshape(N, H, WC).astype(xpad_ref.dtype)

            # ---- gather 3 dy-shifted row blocks into an (NH, 3*WC) slab ----
            slab = jnp.concatenate(
                [xpad_ref[:, dy:dy + H, :].reshape(NH, WC) for dy in range(3)],
                axis=-1)

            # ---- single bf16 MXU matmul, result already lane-dense (NH, WC) ----
            y = jnp.dot(slab, wband, preferred_element_type=jnp.float32)

            # ---- BatchNorm2d (training stats), one affine pass ----
            # Two independent ones-row reductions (stream into the MXU
            # back-to-back), then a block-eye matmul folds over W and
            # broadcasts per-channel stats back to the (1, WC) lane layout.
            s_row = jnp.dot(ones_row, y, preferred_element_type=jnp.float32)
            q_row = jnp.dot(ones_row, y * y, preferred_element_type=jnp.float32)
            mean_row = jnp.dot(s_row, fold, preferred_element_type=jnp.float32) * inv_M
            ex2_row = jnp.dot(q_row, fold, preferred_element_type=jnp.float32) * inv_M
            # E[y^2] - mean^2: conv outputs are ~zero-mean, unit-scale, so no
            # cancellation issue at the test tolerance.
            var_row = ex2_row - mean_row * mean_row
            a_row = gamma_row * jax.lax.rsqrt(var_row + EPS)   # (1, WC)
            c_row = beta_row - mean_row * a_row                # (1, WC)
            out = y * a_row + c_row                            # one FMA-shaped pass
            if relu:
                out = jnp.maximum(out, 0.0)
            return out                                         # (NH, WC) f32

        # ---- fully fused DBlock: residual never leaves VMEM ----
        for r in range(num_res):
            b1 = conv_bn(h_rows, wb_ref[r, 0], g_ref[r, 0], b_ref[r, 0], relu=True)
            b2 = conv_bn(b1,     wb_ref[r, 1], g_ref[r, 1], b_ref[r, 1], relu=False)
            h_rows = h_rows + b2

        o_ref[...] = h_rows.astype(o_ref.dtype)        # lane-dense store

    return kernel


def dblock_forward(x_nhwc, params):
    """x_nhwc: (N, H, W, C) f32.  params: list (per ResBlock) of dicts with
    w1, w2: (9, Cin, Cout) [t = dy*3 + dx]; g1, b1, g2, b2: (1, C)."""
    N, H, W, C = x_nhwc.shape
    R = len(params)
    NH, WC = N * H, W * C

    # Banded conv weights, bf16 matmul operands (f32 accumulate in-kernel).
    wb_all = jnp.stack(
        [jnp.stack([_build_banded(p["w1"], W, C),
                    _build_banded(p["w2"], W, C)]) for p in params]
    ).astype(jnp.bfloat16)                                       # (R, 2, 3*WC, WC)

    # gamma/beta pre-tiled to the lane-dense (1, WC) layout (hoisted broadcasts).
    g_all = jnp.stack([jnp.stack([jnp.tile(p["g1"], (1, W)),
                                  jnp.tile(p["g2"], (1, W))]) for p in params])
    b_all = jnp.stack([jnp.stack([jnp.tile(p["b1"], (1, W)),
                                  jnp.tile(p["b2"], (1, W))]) for p in params])

    # Block-eye fold matrix: sums same-channel lanes over W and broadcasts the
    # per-channel result back to every W position, all in one MXU matmul.
    fold = jnp.tile(jnp.eye(C, dtype=jnp.float32), (W, W))       # (WC, WC)

    # Lane-dense activation slab (last dim = W*C, a multiple of 128 for the
    # test shape -> dense DMA and unmasked stores).
    x_rows = x_nhwc.reshape(NH, WC)

    conv_flops = 2 * NH * (3 * WC) * WC
    bn_flops = 2 * (2 * NH * WC) + 2 * (2 * WC * WC)
    flops = R * 2 * (conv_flops + bn_flops)
    transcendentals = R * 2 * WC
    bytes_accessed = (4 * x_rows.size + 2 * wb_all.size + 4 * g_all.size
                      + 4 * b_all.size + 4 * fold.size + 4 * x_rows.size)

    inputs = (x_rows, wb_all, g_all, b_all, fold)
    kernel = _make_dblock_kernel(N, H, W, C, R)

    out_rows = pl.pallas_call(
        kernel,
        grid=(1,),
        in_specs=[_full_spec(a.shape) for a in inputs],
        out_specs=_full_spec(x_rows.shape),
        out_shape=jax.ShapeDtypeStruct(x_rows.shape, x_nhwc.dtype),
        scratch_shapes=[pltpu.VMEM((N, H + 2, WC), jnp.bfloat16)],
        compiler_params=pltpu.CompilerParams(
            dimension_semantics=("arbitrary",),
            vmem_limit_bytes=32 * 1024 * 1024),
        cost_estimate=pl.CostEstimate(flops=flops,
                                      transcendentals=transcendentals,
                                      bytes_accessed=bytes_accessed),
    )(*inputs)
    return out_rows.reshape(N, H, W, C)


# ---------------- pure-JAX reference (for correctness check) ----------------
def _ref_conv_bn(x_nhwc, w9, gamma, beta, relu):
    C = x_nhwc.shape[-1]
    w_hwio = w9.reshape(3, 3, C, C)
    y = jax.lax.conv_general_dilated(
        x_nhwc, w_hwio, window_strides=(1, 1), padding=((1, 1), (1, 1)),
        dimension_numbers=("NHWC", "HWIO", "NHWC"))
    mean = jnp.mean(y, axis=(0, 1, 2), keepdims=True)
    var = jnp.mean((y - mean) ** 2, axis=(0, 1, 2), keepdims=True)
    y = (y - mean) * jax.lax.rsqrt(var + EPS) * gamma.reshape(1, 1, 1, C) \
        + beta.reshape(1, 1, 1, C)
    if relu:
        y = jnp.maximum(y, 0.0)
    return y


def _ref_dblock(x_nhwc, params):
    h = x_nhwc
    for p in params:
        branch = _ref_conv_bn(h, p["w1"], p["g1"], p["b1"], relu=True)
        h = _ref_conv_bn(branch, p["w2"], p["g2"], p["b2"], relu=False) + h
    return h


# ---------------- parameter init (deterministic, synthetic) ----------------
def init_dblock_params(key, out_channel, num_res):
    params = []
    scale = 1.0 / (3.0 * (out_channel ** 0.5))  # ~ kaiming-ish, fan_in = 9*C
    for _ in range(num_res):
        key, k1, k2 = jax.random.split(key, 3)
        params.append(dict(
            # (9, Cin, Cout): w9[dy*3+dx, cin, cout] == W_torch[cout, cin, dy, dx]
            w1=scale * jax.random.normal(k1, (9, out_channel, out_channel),
                                         jnp.float32),
            g1=jnp.ones((1, out_channel), jnp.float32),   # BN gamma init
            b1=jnp.zeros((1, out_channel), jnp.float32),  # BN beta init
            w2=scale * jax.random.normal(k2, (9, out_channel, out_channel),
                                         jnp.float32),
            g2=jnp.ones((1, out_channel), jnp.float32),
            b2=jnp.zeros((1, out_channel), jnp.float32),
        ))
    return params


if __name__ == "__main__":
    N, C, H, W = 2, 8, 16, 16     # W*C = 128 -> lane-dense slab
    NUM_RES = 2                   # DBlock(out_channel=8, num_res=2) smoke test

    key = jax.random.PRNGKey(0)
    key, kx = jax.random.split(key)
    x_nchw = jax.random.normal(kx, (N, C, H, W), jnp.float32)  # PyTorch NCHW
    x_nhwc = jnp.transpose(x_nchw, (0, 2, 3, 1))               # kernel layout

    params = init_dblock_params(key, C, NUM_RES)

    out_nhwc = dblock_forward(x_nhwc, params)
    out_nchw = jnp.transpose(out_nhwc, (0, 3, 1, 2))
    jax.block_until_ready(out_nchw)

    ref_nhwc = _ref_dblock(x_nhwc, params)
    ref_nchw = jnp.transpose(ref_nhwc, (0, 3, 1, 2))
    jax.block_until_ready(ref_nchw)

    assert out_nchw.shape == x_nchw.shape
    # bf16 matmul operands (f32 accumulate) -> relaxed tolerance vs f32 reference.
    err = float(jnp.max(jnp.abs(out_nchw - ref_nchw)))
    assert jnp.allclose(out_nchw, ref_nchw, rtol=3e-2, atol=3e-2), err

    print("KERNEL_OK")
</pallas_src>

<mosaic_0001>
module attributes {stable_mosaic.version = 11 : i64} {
  func.func @kernel(%arg0: i32, %arg1: memref<32x128xf32, #tpu.memory_space<vmem>>, %arg2: memref<2x2x384x128xbf16, #tpu.memory_space<vmem>>, %arg3: memref<2x2x1x128xf32, #tpu.memory_space<vmem>>, %arg4: memref<2x2x1x128xf32, #tpu.memory_space<vmem>>, %arg5: memref<128x128xf32, #tpu.memory_space<vmem>>, %arg6: memref<32x128xf32, #tpu.memory_space<vmem>>, %arg7: memref<2x18x128xbf16, #tpu.memory_space<vmem>>) attributes {dimension_semantics = [#tpu.dimension_semantics<arbitrary>], iteration_bounds = array<i64: 1>, scalar_prefetch = 0 : i64, scratch_operands = 1 : i64, tpu.core_type = #tpu.core_type<tc>, window_params = [{pipeline_mode = #tpu.pipeline_mode<synchronous>, transform_indices = @transform_0, window_bounds = array<i64: 32, 128>}, {pipeline_mode = #tpu.pipeline_mode<synchronous>, transform_indices = @transform_1, window_bounds = array<i64: 2, 2, 384, 128>}, {pipeline_mode = #tpu.pipeline_mode<synchronous>, transform_indices = @transform_2, window_bounds = array<i64: 2, 2, 1, 128>}, {pipeline_mode = #tpu.pipeline_mode<synchronous>, transform_indices = @transform_3, window_bounds = array<i64: 2, 2, 1, 128>}, {pipeline_mode = #tpu.pipeline_mode<synchronous>, transform_indices = @transform_4, window_bounds = array<i64: 128, 128>}, {pipeline_mode = #tpu.pipeline_mode<synchronous>, transform_indices = @transform_5, window_bounds = array<i64: 32, 128>}]} {
    %cst = arith.constant 0.000000e+00 : bf16
    %0 = vector.broadcast %cst : bf16 to vector<2x18x128xbf16>
    %c0 = arith.constant 0 : index
    %c0_0 = arith.constant 0 : index
    %c0_1 = arith.constant 0 : index
    %1 = vector.load %arg7[%c0, %c0_0, %c0_1] : memref<2x18x128xbf16, #tpu.memory_space<vmem>>, vector<2x18x128xbf16>
    tpu.vector_store %arg7[%c0, %c0_0, %c0_1], %0 {strides = array<i32>} : memref<2x18x128xbf16, #tpu.memory_space<vmem>>, vector<2x18x128xbf16>,
    %cst_2 = arith.constant 1.000000e+00 : f32
    %2 = vector.broadcast %cst_2 : f32 to vector<1x32xf32>
    %c0_3 = arith.constant 0 : index
    %c0_4 = arith.constant 0 : index
    %3 = vector.load %arg5[%c0_3, %c0_4] : memref<128x128xf32, #tpu.memory_space<vmem>>, vector<128x128xf32>
    %c0_5 = arith.constant 0 : index
    %c0_6 = arith.constant 0 : index
    %4 = vector.load %arg1[%c0_5, %c0_6] : memref<32x128xf32, #tpu.memory_space<vmem>>, vector<32x128xf32>
    %c0_7 = arith.constant 0 : index
    %c0_8 = arith.constant 0 : index
    %c0_9 = arith.constant 0 : index
    %c0_10 = arith.constant 0 : index
    %5 = vector.load %arg2[%c0_7, %c0_8, %c0_9, %c0_10] : memref<2x2x384x128xbf16, #tpu.memory_space<vmem>>, vector<1x1x384x128xbf16>
    %6 = vector.shape_cast %5 : vector<1x1x384x128xbf16> to vector<384x128xbf16>
    %c0_11 = arith.constant 0 : index
    %c0_12 = arith.constant 0 : index
    %c0_13 = arith.constant 0 : index
    %c0_14 = arith.constant 0 : index
    %7 = vector.load %arg3[%c0_11, %c0_12, %c0_13, %c0_14] : memref<2x2x1x128xf32, #tpu.memory_space<vmem>>, vector<1x1x1x128xf32>
    %8 = vector.shape_cast %7 : vector<1x1x1x128xf32> to vector<1x128xf32>
    %c0_15 = arith.constant 0 : index
    %c0_16 = arith.constant 0 : index
    %c0_17 = arith.constant 0 : index
    %c0_18 = arith.constant 0 : index
    %9 = vector.load %arg4[%c0_15, %c0_16, %c0_17, %c0_18] : memref<2x2x1x128xf32, #tpu.memory_space<vmem>>, vector<1x1x1x128xf32>
    %10 = vector.shape_cast %9 : vector<1x1x1x128xf32> to vector<1x128xf32>
    %11 = vector.shape_cast %4 : vector<32x128xf32> to vector<2x16x128xf32>
    %12 = arith.truncf %11 : vector<2x16x128xf32> to vector<2x16x128xbf16>
    %c0_19 = arith.constant 0 : index
    %c1 = arith.constant 1 : index
    %c0_20 = arith.constant 0 : index
    %13 = vector.load %arg7[%c0_19, %c1, %c0_20] : memref<2x18x128xbf16, #tpu.memory_space<vmem>>, vector<2x16x128xbf16>
    tpu.vector_store %arg7[%c0_19, %c1, %c0_20], %12 {strides = array<i32>} : memref<2x18x128xbf16, #tpu.memory_space<vmem>>, vector<2x16x128xbf16>,
    %c0_21 = arith.constant 0 : index
    %c0_22 = arith.constant 0 : index
    %c0_23 = arith.constant 0 : index
    %14 = vector.load %arg7[%c0_21, %c0_22, %c0_23] : memref<2x18x128xbf16, #tpu.memory_space<vmem>>, vector<2x16x128xbf16>
    %15 = vector.shape_cast %14 : vector<2x16x128xbf16> to vector<32x128xbf16>
    %c0_24 = arith.constant 0 : index
    %c1_25 = arith.constant 1 : index
    %c0_26 = arith.constant 0 : index
    %16 = vector.load %arg7[%c0_24, %c1_25, %c0_26] : memref<2x18x128xbf16, #tpu.memory_space<vmem>>, vector<2x16x128xbf16>
    %17 = vector.shape_cast %16 : vector<2x16x128xbf16> to vector<32x128xbf16>
    %c0_27 = arith.constant 0 : index
    %c2 = arith.constant 2 : index
    %c0_28 = arith.constant 0 : index
    %18 = vector.load %arg7[%c0_27, %c2, %c0_28] : memref<2x18x128xbf16, #tpu.memory_space<vmem>>, vector<2x16x128xbf16>
    %19 = vector.shape_cast %18 : vector<2x16x128xbf16> to vector<32x128xbf16>
    %20 = tpu.concatenate %15, %17, %19 in 1 : vector<32x128xbf16>, vector<32x128xbf16>, vector<32x128xbf16> -> vector<32x384xbf16>
    %cst_29 = arith.constant dense<0.000000e+00> : vector<32x128xf32>
    %21 = tpu.matmul %20, %6, %cst_29 {dimension_numbers = #tpu.dot_dimension_numbers<[1], [0], [0], [1], [0, 0, 1, 1], [], []>} : vector<32x384xbf16>, vector<384x128xbf16>, vector<32x128xf32> -> vector<32x128xf32>
    %cst_30 = arith.constant dense<0.000000e+00> : vector<1x128xf32>
    %22 = tpu.matmul %2, %21, %cst_30 {dimension_numbers = #tpu.dot_dimension_numbers<[1], [0], [0], [1], [0, 0, 1, 1], [], []>} : vector<1x32xf32>, vector<32x128xf32>, vector<1x128xf32> -> vector<1x128xf32>
    %23 = arith.mulf %21, %21 : vector<32x128xf32>
    %cst_31 = arith.constant dense<0.000000e+00> : vector<1x128xf32>
    %24 = tpu.matmul %2, %23, %cst_31 {dimension_numbers = #tpu.dot_dimension_numbers<[1], [0], [0], [1], [0, 0, 1, 1], [], []>} : vector<1x32xf32>, vector<32x128xf32>, vector<1x128xf32> -> vector<1x128xf32>
    %cst_32 = arith.constant dense<0.000000e+00> : vector<1x128xf32>
    %25 = tpu.matmul %22, %3, %cst_32 {dimension_numbers = #tpu.dot_dimension_numbers<[1], [0], [0], [1], [0, 0, 1, 1], [], []>} : vector<1x128xf32>, vector<128x128xf32>, vector<1x128xf32> -> vector<1x128xf32>
    %cst_33 = arith.constant 0.001953125 : f32
    %26 = vector.broadcast %cst_33 : f32 to vector<1x128xf32>
    %27 = arith.mulf %25, %26 : vector<1x128xf32>
    %cst_34 = arith.constant dense<0.000000e+00> : vector<1x128xf32>
    %28 = tpu.matmul %24, %3, %cst_34 {dimension_numbers = #tpu.dot_dimension_numbers<[1], [0], [0], [1], [0, 0, 1, 1], [], []>} : vector<1x128xf32>, vector<128x128xf32>, vector<1x128xf32> -> vector<1x128xf32>
    %cst_35 = arith.constant 0.001953125 : f32
    %29 = vector.broadcast %cst_35 : f32 to vector<1x128xf32>
    %30 = arith.mulf %28, %29 : vector<1x128xf32>
    %31 = arith.mulf %27, %27 : vector<1x128xf32>
    %32 = arith.subf %30, %31 : vector<1x128xf32>
    %cst_36 = arith.constant 9.99999974E-6 : f32
    %33 = vector.broadcast %cst_36 : f32 to vector<1x128xf32>
    %34 = arith.addf %32, %33 : vector<1x128xf32>
    %35 = math.rsqrt %34 : vector<1x128xf32>
    %36 = arith.mulf %8, %35 : vector<1x128xf32>
    %37 = arith.mulf %27, %36 : vector<1x128xf32>
    %38 = arith.subf %10, %37 : vector<1x128xf32>
    %39 = vector.broadcast %36 : vector<1x128xf32> to vector<32x128xf32>
    %40 = arith.mulf %21, %39 : vector<32x128xf32>
    %41 = vector.broadcast %38 : vector<1x128xf32> to vector<32x128xf32>
    %42 = arith.addf %40, %41 : vector<32x128xf32>
    %cst_37 = arith.constant 0.000000e+00 : f32
    %43 = vector.broadcast %cst_37 : f32 to vector<32x128xf32>
    %44 = arith.maximumf %42, %43 : vector<32x128xf32>
    %c0_38 = arith.constant 0 : index
    %c1_39 = arith.constant 1 : index
    %c0_40 = arith.constant 0 : index
    %c0_41 = arith.constant 0 : index
    %45 = vector.load %arg2[%c0_38, %c1_39, %c0_40, %c0_41] : memref<2x2x384x128xbf16, #tpu.memory_space<vmem>>, vector<1x1x384x128xbf16>
    %46 = vector.shape_cast %45 : vector<1x1x384x128xbf16> to vector<384x128xbf16>
    %c0_42 = arith.constant 0 : index
    %c1_43 = arith.constant 1 : index
    %c0_44 = arith.constant 0 : index
    %c0_45 = arith.constant 0 : index
    %47 = vector.load %arg3[%c0_42, %c1_43, %c0_44, %c0_45] : memref<2x2x1x128xf32, #tpu.memory_space<vmem>>, vector<1x1x1x128xf32>
    %48 = vector.shape_cast %47 : vector<1x1x1x128xf32> to vector<1x128xf32>
    %c0_46 = arith.constant 0 : index
    %c1_47 = arith.constant 1 : index
    %c0_48 = arith.constant 0 : index
    %c0_49 = arith.constant 0 : index
    %49 = vector.load %arg4[%c0_46, %c1_47, %c0_48, %c0_49] : memref<2x2x1x128xf32, #tpu.memory_space<vmem>>, vector<1x1x1x128xf32>
    %50 = vector.shape_cast %49 : vector<1x1x1x128xf32> to vector<1x128xf32>
    %51 = vector.shape_cast %44 : vector<32x128xf32> to vector<2x16x128xf32>
    %52 = arith.truncf %51 : vector<2x16x128xf32> to vector<2x16x128xbf16>
    %c0_50 = arith.constant 0 : index
    %c1_51 = arith.constant 1 : index
    %c0_52 = arith.constant 0 : index
    %53 = vector.load %arg7[%c0_50, %c1_51, %c0_52] : memref<2x18x128xbf16, #tpu.memory_space<vmem>>, vector<2x16x128xbf16>
    tpu.vector_store %arg7[%c0_50, %c1_51, %c0_52], %52 {strides = array<i32>} : memref<2x18x128xbf16, #tpu.memory_space<vmem>>, vector<2x16x128xbf16>,
    %c0_53 = arith.constant 0 : index
    %c0_54 = arith.constant 0 : index
    %c0_55 = arith.constant 0 : index
    %54 = vector.load %arg7[%c0_53, %c0_54, %c0_55] : memref<2x18x128xbf16, #tpu.memory_space<vmem>>, vector<2x16x128xbf16>
    %55 = vector.shape_cast %54 : vector<2x16x128xbf16> to vector<32x128xbf16>
    %c0_56 = arith.constant 0 : index
    %c1_57 = arith.constant 1 : index
    %c0_58 = arith.constant 0 : index
    %56 = vector.load %arg7[%c0_56, %c1_57, %c0_58] : memref<2x18x128xbf16, #tpu.memory_space<vmem>>, vector<2x16x128xbf16>
    %57 = vector.shape_cast %56 : vector<2x16x128xbf16> to vector<32x128xbf16>
    %c0_59 = arith.constant 0 : index
    %c2_60 = arith.constant 2 : index
    %c0_61 = arith.constant 0 : index
    %58 = vector.load %arg7[%c0_59, %c2_60, %c0_61] : memref<2x18x128xbf16, #tpu.memory_space<vmem>>, vector<2x16x128xbf16>
    %59 = vector.shape_cast %58 : vector<2x16x128xbf16> to vector<32x128xbf16>
    %60 = tpu.concatenate %55, %57, %59 in 1 : vector<32x128xbf16>, vector<32x128xbf16>, vector<32x128xbf16> -> vector<32x384xbf16>
    %cst_62 = arith.constant dense<0.000000e+00> : vector<32x128xf32>
    %61 = tpu.matmul %60, %46, %cst_62 {dimension_numbers = #tpu.dot_dimension_numbers<[1], [0], [0], [1], [0, 0, 1, 1], [], []>} : vector<32x384xbf16>, vector<384x128xbf16>, vector<32x128xf32> -> vector<32x128xf32>
    %cst_63 = arith.constant dense<0.000000e+00> : vector<1x128xf32>
    %62 = tpu.matmul %2, %61, %cst_63 {dimension_numbers = #tpu.dot_dimension_numbers<[1], [0], [0], [1], [0, 0, 1, 1], [], []>} : vector<1x32xf32>, vector<32x128xf32>, vector<1x128xf32> -> vector<1x128xf32>
    %63 = arith.mulf %61, %61 : vector<32x128xf32>
    %cst_64 = arith.constant dense<0.000000e+00> : vector<1x128xf32>
    %64 = tpu.matmul %2, %63, %cst_64 {dimension_numbers = #tpu.dot_dimension_numbers<[1], [0], [0], [1], [0, 0, 1, 1], [], []>} : vector<1x32xf32>, vector<32x128xf32>, vector<1x128xf32> -> vector<1x128xf32>
    %cst_65 = arith.constant dense<0.000000e+00> : vector<1x128xf32>
    %65 = tpu.matmul %62, %3, %cst_65 {dimension_numbers = #tpu.dot_dimension_numbers<[1], [0], [0], [1], [0, 0, 1, 1], [], []>} : vector<1x128xf32>, vector<128x128xf32>, vector<1x128xf32> -> vector<1x128xf32>
    %cst_66 = arith.constant 0.001953125 : f32
    %66 = vector.broadcast %cst_66 : f32 to vector<1x128xf32>
    %67 = arith.mulf %65, %66 : vector<1x128xf32>
    %cst_67 = arith.constant dense<0.000000e+00> : vector<1x128xf32>
    %68 = tpu.matmul %64, %3, %cst_67 {dimension_numbers = #tpu.dot_dimension_numbers<[1], [0], [0], [1], [0, 0, 1, 1], [], []>} : vector<1x128xf32>, vector<128x128xf32>, vector<1x128xf32> -> vector<1x128xf32>
    %cst_68 = arith.constant 0.001953125 : f32
    %69 = vector.broadcast %cst_68 : f32 to vector<1x128xf32>
    %70 = arith.mulf %68, %69 : vector<1x128xf32>
    %71 = arith.mulf %67, %67 : vector<1x128xf32>
    %72 = arith.subf %70, %71 : vector<1x128xf32>
    %cst_69 = arith.constant 9.99999974E-6 : f32
    %73 = vector.broadcast %cst_69 : f32 to vector<1x128xf32>
    %74 = arith.addf %72, %73 : vector<1x128xf32>
    %75 = math.rsqrt %74 : vector<1x128xf32>
    %76 = arith.mulf %48, %75 : vector<1x128xf32>
    %77 = arith.mulf %67, %76 : vector<1x128xf32>
    %78 = arith.subf %50, %77 : vector<1x128xf32>
    %79 = vector.broadcast %76 : vector<1x128xf32> to vector<32x128xf32>
    %80 = arith.mulf %61, %79 : vector<32x128xf32>
    %81 = vector.broadcast %78 : vector<1x128xf32> to vector<32x128xf32>
    %82 = arith.addf %80, %81 : vector<32x128xf32>
    %83 = arith.addf %4, %82 : vector<32x128xf32>
    %c1_70 = arith.constant 1 : index
    %c0_71 = arith.constant 0 : index
    %c0_72 = arith.constant 0 : index
    %c0_73 = arith.constant 0 : index
    %84 = vector.load %arg2[%c1_70, %c0_71, %c0_72, %c0_73] : memref<2x2x384x128xbf16, #tpu.memory_space<vmem>>, vector<1x1x384x128xbf16>
    %85 = vector.shape_cast %84 : vector<1x1x384x128xbf16> to vector<384x128xbf16>
    %c1_74 = arith.constant 1 : index
    %c0_75 = arith.constant 0 : index
    %c0_76 = arith.constant 0 : index
    %c0_77 = arith.constant 0 : index
    %86 = vector.load %arg3[%c1_74, %c0_75, %c0_76, %c0_77] : memref<2x2x1x128xf32, #tpu.memory_space<vmem>>, vector<1x1x1x128xf32>
    %87 = vector.shape_cast %86 : vector<1x1x1x128xf32> to vector<1x128xf32>
    %c1_78 = arith.constant 1 : index
    %c0_79 = arith.constant 0 : index
    %c0_80 = arith.constant 0 : index
    %c0_81 = arith.constant 0 : index
    %88 = vector.load %arg4[%c1_78, %c0_79, %c0_80, %c0_81] : memref<2x2x1x128xf32, #tpu.memory_space<vmem>>, vector<1x1x1x128xf32>
    %89 = vector.shape_cast %88 : vector<1x1x1x128xf32> to vector<1x128xf32>
    %90 = vector.shape_cast %83 : vector<32x128xf32> to vector<2x16x128xf32>
    %91 = arith.truncf %90 : vector<2x16x128xf32> to vector<2x16x128xbf16>
    %c0_82 = arith.constant 0 : index
    %c1_83 = arith.constant 1 : index
    %c0_84 = arith.constant 0 : index
    %92 = vector.load %arg7[%c0_82, %c1_83, %c0_84] : memref<2x18x128xbf16, #tpu.memory_space<vmem>>, vector<2x16x128xbf16>
    tpu.vector_store %arg7[%c0_82, %c1_83, %c0_84], %91 {strides = array<i32>} : memref<2x18x128xbf16, #tpu.memory_space<vmem>>, vector<2x16x128xbf16>,
    %c0_85 = arith.constant 0 : index
    %c0_86 = arith.constant 0 : index
    %c0_87 = arith.constant 0 : index
    %93 = vector.load %arg7[%c0_85, %c0_86, %c0_87] : memref<2x18x128xbf16, #tpu.memory_space<vmem>>, vector<2x16x128xbf16>
    %94 = vector.shape_cast %93 : vector<2x16x128xbf16> to vector<32x128xbf16>
    %c0_88 = arith.constant 0 : index
    %c1_89 = arith.constant 1 : index
    %c0_90 = arith.constant 0 : index
    %95 = vector.load %arg7[%c0_88, %c1_89, %c0_90] : memref<2x18x128xbf16, #tpu.memory_space<vmem>>, vector<2x16x128xbf16>
    %96 = vector.shape_cast %95 : vector<2x16x128xbf16> to vector<32x128xbf16>
    %c0_91 = arith.constant 0 : index
    %c2_92 = arith.constant 2 : index
    %c0_93 = arith.constant 0 : index
    %97 = vector.load %arg7[%c0_91, %c2_92, %c0_93] : memref<2x18x128xbf16, #tpu.memory_space<vmem>>, vector<2x16x128xbf16>
    %98 = vector.shape_cast %97 : vector<2x16x128xbf16> to vector<32x128xbf16>
    %99 = tpu.concatenate %94, %96, %98 in 1 : vector<32x128xbf16>, vector<32x128xbf16>, vector<32x128xbf16> -> vector<32x384xbf16>
    %cst_94 = arith.constant dense<0.000000e+00> : vector<32x128xf32>
    %100 = tpu.matmul %99, %85, %cst_94 {dimension_numbers = #tpu.dot_dimension_numbers<[1], [0], [0], [1], [0, 0, 1, 1], [], []>} : vector<32x384xbf16>, vector<384x128xbf16>, vector<32x128xf32> -> vector<32x128xf32>
    %cst_95 = arith.constant dense<0.000000e+00> : vector<1x128xf32>
    %101 = tpu.matmul %2, %100, %cst_95 {dimension_numbers = #tpu.dot_dimension_numbers<[1], [0], [0], [1], [0, 0, 1, 1], [], []>} : vector<1x32xf32>, vector<32x128xf32>, vector<1x128xf32> -> vector<1x128xf32>
    %102 = arith.mulf %100, %100 : vector<32x128xf32>
    %cst_96 = arith.constant dense<0.000000e+00> : vector<1x128xf32>
    %103 = tpu.matmul %2, %102, %cst_96 {dimension_numbers = #tpu.dot_dimension_numbers<[1], [0], [0], [1], [0, 0, 1, 1], [], []>} : vector<1x32xf32>, vector<32x128xf32>, vector<1x128xf32> -> vector<1x128xf32>
    %cst_97 = arith.constant dense<0.000000e+00> : vector<1x128xf32>
    %104 = tpu.matmul %101, %3, %cst_97 {dimension_numbers = #tpu.dot_dimension_numbers<[1], [0], [0], [1], [0, 0, 1, 1], [], []>} : vector<1x128xf32>, vector<128x128xf32>, vector<1x128xf32> -> vector<1x128xf32>
    %cst_98 = arith.constant 0.001953125 : f32
    %105 = vector.broadcast %cst_98 : f32 to vector<1x128xf32>
    %106 = arith.mulf %104, %105 : vector<1x128xf32>
    %cst_99 = arith.constant dense<0.000000e+00> : vector<1x128xf32>
    %107 = tpu.matmul %103, %3, %cst_99 {dimension_numbers = #tpu.dot_dimension_numbers<[1], [0], [0], [1], [0, 0, 1, 1], [], []>} : vector<1x128xf32>, vector<128x128xf32>, vector<1x128xf32> -> vector<1x128xf32>
    %cst_100 = arith.constant 0.001953125 : f32
    %108 = vector.broadcast %cst_100 : f32 to vector<1x128xf32>
    %109 = arith.mulf %107, %108 : vector<1x128xf32>
    %110 = arith.mulf %106, %106 : vector<1x128xf32>
    %111 = arith.subf %109, %110 : vector<1x128xf32>
    %cst_101 = arith.constant 9.99999974E-6 : f32
    %112 = vector.broadcast %cst_101 : f32 to vector<1x128xf32>
    %113 = arith.addf %111, %112 : vector<1x128xf32>
    %114 = math.rsqrt %113 : vector<1x128xf32>
    %115 = arith.mulf %87, %114 : vector<1x128xf32>
    %116 = arith.mulf %106, %115 : vector<1x128xf32>
    %117 = arith.subf %89, %116 : vector<1x128xf32>
    %118 = vector.broadcast %115 : vector<1x128xf32> to vector<32x128xf32>
    %119 = arith.mulf %100, %118 : vector<32x128xf32>
    %120 = vector.broadcast %117 : vector<1x128xf32> to vector<32x128xf32>
    %121 = arith.addf %119, %120 : vector<32x128xf32>
    %cst_102 = arith.constant 0.000000e+00 : f32
    %122 = vector.broadcast %cst_102 : f32 to vector<32x128xf32>
    %123 = arith.maximumf %121, %122 : vector<32x128xf32>
    %c1_103 = arith.constant 1 : index
    %c1_104 = arith.constant 1 : index
    %c0_105 = arith.constant 0 : index
    %c0_106 = arith.constant 0 : index
    %124 = vector.load %arg2[%c1_103, %c1_104, %c0_105, %c0_106] : memref<2x2x384x128xbf16, #tpu.memory_space<vmem>>, vector<1x1x384x128xbf16>
    %125 = vector.shape_cast %124 : vector<1x1x384x128xbf16> to vector<384x128xbf16>
    %c1_107 = arith.constant 1 : index
    %c1_108 = arith.constant 1 : index
    %c0_109 = arith.constant 0 : index
    %c0_110 = arith.constant 0 : index
    %126 = vector.load %arg3[%c1_107, %c1_108, %c0_109, %c0_110] : memref<2x2x1x128xf32, #tpu.memory_space<vmem>>, vector<1x1x1x128xf32>
    %127 = vector.shape_cast %126 : vector<1x1x1x128xf32> to vector<1x128xf32>
    %c1_111 = arith.constant 1 : index
    %c1_112 = arith.constant 1 : index
    %c0_113 = arith.constant 0 : index
    %c0_114 = arith.constant 0 : index
    %128 = vector.load %arg4[%c1_111, %c1_112, %c0_113, %c0_114] : memref<2x2x1x128xf32, #tpu.memory_space<vmem>>, vector<1x1x1x128xf32>
    %129 = vector.shape_cast %128 : vector<1x1x1x128xf32> to vector<1x128xf32>
    %130 = vector.shape_cast %123 : vector<32x128xf32> to vector<2x16x128xf32>
    %131 = arith.truncf %130 : vector<2x16x128xf32> to vector<2x16x128xbf16>
    %c0_115 = arith.constant 0 : index
    %c1_116 = arith.constant 1 : index
    %c0_117 = arith.constant 0 : index
    %132 = vector.load %arg7[%c0_115, %c1_116, %c0_117] : memref<2x18x128xbf16, #tpu.memory_space<vmem>>, vector<2x16x128xbf16>
    tpu.vector_store %arg7[%c0_115, %c1_116, %c0_117], %131 {strides = array<i32>} : memref<2x18x128xbf16, #tpu.memory_space<vmem>>, vector<2x16x128xbf16>,
    %c0_118 = arith.constant 0 : index
    %c0_119 = arith.constant 0 : index
    %c0_120 = arith.constant 0 : index
    %133 = vector.load %arg7[%c0_118, %c0_119, %c0_120] : memref<2x18x128xbf16, #tpu.memory_space<vmem>>, vector<2x16x128xbf16>
    %134 = vector.shape_cast %133 : vector<2x16x128xbf16> to vector<32x128xbf16>
    %c0_121 = arith.constant 0 : index
    %c1_122 = arith.constant 1 : index
    %c0_123 = arith.constant 0 : index
    %135 = vector.load %arg7[%c0_121, %c1_122, %c0_123] : memref<2x18x128xbf16, #tpu.memory_space<vmem>>, vector<2x16x128xbf16>
    %136 = vector.shape_cast %135 : vector<2x16x128xbf16> to vector<32x128xbf16>
    %c0_124 = arith.constant 0 : index
    %c2_125 = arith.constant 2 : index
    %c0_126 = arith.constant 0 : index
    %137 = vector.load %arg7[%c0_124, %c2_125, %c0_126] : memref<2x18x128xbf16, #tpu.memory_space<vmem>>, vector<2x16x128xbf16>
    %138 = vector.shape_cast %137 : vector<2x16x128xbf16> to vector<32x128xbf16>
    %139 = tpu.concatenate %134, %136, %138 in 1 : vector<32x128xbf16>, vector<32x128xbf16>, vector<32x128xbf16> -> vector<32x384xbf16>
    %cst_127 = arith.constant dense<0.000000e+00> : vector<32x128xf32>
    %140 = tpu.matmul %139, %125, %cst_127 {dimension_numbers = #tpu.dot_dimension_numbers<[1], [0], [0], [1], [0, 0, 1, 1], [], []>} : vector<32x384xbf16>, vector<384x128xbf16>, vector<32x128xf32> -> vector<32x128xf32>
    %cst_128 = arith.constant dense<0.000000e+00> : vector<1x128xf32>
    %141 = tpu.matmul %2, %140, %cst_128 {dimension_numbers = #tpu.dot_dimension_numbers<[1], [0], [0], [1], [0, 0, 1, 1], [], []>} : vector<1x32xf32>, vector<32x128xf32>, vector<1x128xf32> -> vector<1x128xf32>
    %142 = arith.mulf %140, %140 : vector<32x128xf32>
    %cst_129 = arith.constant dense<0.000000e+00> : vector<1x128xf32>
    %143 = tpu.matmul %2, %142, %cst_129 {dimension_numbers = #tpu.dot_dimension_numbers<[1], [0], [0], [1], [0, 0, 1, 1], [], []>} : vector<1x32xf32>, vector<32x128xf32>, vector<1x128xf32> -> vector<1x128xf32>
    %cst_130 = arith.constant dense<0.000000e+00> : vector<1x128xf32>
    %144 = tpu.matmul %141, %3, %cst_130 {dimension_numbers = #tpu.dot_dimension_numbers<[1], [0], [0], [1], [0, 0, 1, 1], [], []>} : vector<1x128xf32>, vector<128x128xf32>, vector<1x128xf32> -> vector<1x128xf32>
    %cst_131 = arith.constant 0.001953125 : f32
    %145 = vector.broadcast %cst_131 : f32 to vector<1x128xf32>
    %146 = arith.mulf %144, %145 : vector<1x128xf32>
    %cst_132 = arith.constant dense<0.000000e+00> : vector<1x128xf32>
    %147 = tpu.matmul %143, %3, %cst_132 {dimension_numbers = #tpu.dot_dimension_numbers<[1], [0], [0], [1], [0, 0, 1, 1], [], []>} : vector<1x128xf32>, vector<128x128xf32>, vector<1x128xf32> -> vector<1x128xf32>
    %cst_133 = arith.constant 0.001953125 : f32
    %148 = vector.broadcast %cst_133 : f32 to vector<1x128xf32>
    %149 = arith.mulf %147, %148 : vector<1x128xf32>
    %150 = arith.mulf %146, %146 : vector<1x128xf32>
    %151 = arith.subf %149, %150 : vector<1x128xf32>
    %cst_134 = arith.constant 9.99999974E-6 : f32
    %152 = vector.broadcast %cst_134 : f32 to vector<1x128xf32>
    %153 = arith.addf %151, %152 : vector<1x128xf32>
    %154 = math.rsqrt %153 : vector<1x128xf32>
    %155 = arith.mulf %127, %154 : vector<1x128xf32>
    %156 = arith.mulf %146, %155 : vector<1x128xf32>
    %157 = arith.subf %129, %156 : vector<1x128xf32>
    %158 = vector.broadcast %155 : vector<1x128xf32> to vector<32x128xf32>
    %159 = arith.mulf %140, %158 : vector<32x128xf32>
    %160 = vector.broadcast %157 : vector<1x128xf32> to vector<32x128xf32>
    %161 = arith.addf %159, %160 : vector<32x128xf32>
    %162 = arith.addf %83, %161 : vector<32x128xf32>
    %c0_135 = arith.constant 0 : index
    %c0_136 = arith.constant 0 : index
    %163 = vector.load %arg6[%c0_135, %c0_136] : memref<32x128xf32, #tpu.memory_space<vmem>>, vector<32x128xf32>
    tpu.vector_store %arg6[%c0_135, %c0_136], %162 {strides = array<i32>} : memref<32x128xf32, #tpu.memory_space<vmem>>, vector<32x128xf32>,
    return
  }
  func.func @transform_0(%arg0: i32) -> (i32, i32) {
    %c0_i32 = arith.constant 0 : i32
    %c0_i32_0 = arith.constant 0 : i32
    %c0_i32_1 = arith.constant 0 : i32
    return %c0_i32, %c0_i32_0 : i32, i32
  }
  func.func @transform_1(%arg0: i32) -> (i32, i32, i32, i32) {
    %c0_i32 = arith.constant 0 : i32
    %c0_i32_0 = arith.constant 0 : i32
    %c0_i32_1 = arith.constant 0 : i32
    %c0_i32_2 = arith.constant 0 : i32
    %c0_i32_3 = arith.constant 0 : i32
    return %c0_i32, %c0_i32_0, %c0_i32_1, %c0_i32_2 : i32, i32, i32, i32
  }
  func.func @transform_2(%arg0: i32) -> (i32, i32, i32, i32) {
    %c0_i32 = arith.constant 0 : i32
    %c0_i32_0 = arith.constant 0 : i32
    %c0_i32_1 = arith.constant 0 : i32
    %c0_i32_2 = arith.constant 0 : i32
    %c0_i32_3 = arith.constant 0 : i32
    return %c0_i32, %c0_i32_0, %c0_i32_1, %c0_i32_2 : i32, i32, i32, i32
  }
  func.func @transform_3(%arg0: i32) -> (i32, i32, i32, i32) {
    %c0_i32 = arith.constant 0 : i32
    %c0_i32_0 = arith.constant 0 : i32
    %c0_i32_1 = arith.constant 0 : i32
    %c0_i32_2 = arith.constant 0 : i32
    %c0_i32_3 = arith.constant 0 : i32
    return %c0_i32, %c0_i32_0, %c0_i32_1, %c0_i32_2 : i32, i32, i32, i32
  }
  func.func @transform_4(%arg0: i32) -> (i32, i32) {
    %c0_i32 = arith.constant 0 : i32
    %c0_i32_0 = arith.constant 0 : i32
    %c0_i32_1 = arith.constant 0 : i32
    return %c0_i32, %c0_i32_0 : i32, i32
  }
  func.func @transform_5(%arg0: i32) -> (i32, i32) {
    %c0_i32 = arith.constant 0 : i32
    %c0_i32_0 = arith.constant 0 : i32
    %c0_i32_1 = arith.constant 0 : i32
    return %c0_i32, %c0_i32_0 : i32, i32
  }
}

</mosaic_0001>

<bundles_post_ra>
// kernel: tpu_custom_call.1
= control target key start
LH: loop header
LB: loop body
LE: loop exit
PB: predicated region body
PF: predicated region fallthrough
CT: control target
= control target key end

     0   :  { %10 = vsyncpa [#allocation4], 0  ;;  %s5274_s0 = inlined_call_operand.hbm [shape: f32[32,128], index: 0, kind: input, shape index: {}]   ;;  %s5275_s1 = inlined_call_operand.hbm [shape: bf16[2,2,384,128], index: 1, kind: input, shape index: {}]   ;;  %s5276_s2 = inlined_call_operand.vmem [shape: f32[2,2,1,128], index: 2, kind: input, shape index: {}]   ;;  %s5277_s3 = inlined_call_operand.vmem [shape: f32[2,2,1,128], index: 3, kind: input, shape index: {}]   ;;  %s5278_s4 = inlined_call_operand.hbm [shape: f32[128,128], index: 4, kind: input, shape index: {}]   ;;  %s5279_s5 = inlined_call_operand.hbm [shape: f32[32,128], index: 5, kind: output, shape index: {}]  }
   0x1   :  { %11 = vsyncpa [#allocation7], 0 }
   0x2   :  { %12 = vsyncpa [#allocation5], 0  ;;  %s4656_s18 = smov [#allocation6]   ;;  %s4562_s22 = scalar_lea.hbm %s5275_s1, 12288 }
   0x3   :  { %s30_s19 = sshll.u32 %s4656_s18, 4  ;;  %p4563_p0 = scmp.ne.s32.totalorder %s5275_s1, %s4562_s22  ;;  %s31_s19 = int_to_ptr.vmem [resolvable:$true] %s30_s19 }
   0x4   :  { %p4566_p1 = scmp.lt.u32.totalorder %s4562_s22, %s5275_s1 }
   0x6   :  { %p4568_p2 = pnand %p4566_p1, %p4563_p0 }
   0x8   :  { %4571 = shalt.err (!%p4568_p2)
}
   0x9   :  { %s4572_s27 = scalar_lea.vmem %s31_s19, 12288  ;;  %p4577_p4 = scmp.lt.s32.totalorder %s31_s19, %s31_s19 }
   0xa   :  { %p4573_p3 = scmp.ne.s32.totalorder %s31_s19, %s4572_s27  ;;  %p4578_p5 = scmp.lt.s32.totalorder %s4572_s27, %s4572_s27 }
   0xc   :  { %p4579_p6 = por %p4578_p5, %p4577_p4 }
   0xe   :  { %p4580_p7 = pnand %p4579_p6, %p4573_p3 }
  0x10   :  { %4583 = shalt.err (!%p4580_p7)
}
  0x11   :  { %s4657_s28 = smov 64   ;;  %s4658_s29 = smov 4  }
  0x12   :  { %36 = dma.hbm_to_vmem [thread:$0]  %s5275_s1, 12288, %s31_s19, [#allocation7], %s4657_s28, %s4657_s28, %s4658_s29  }
  0x13   :  { %s4659_s7 = smov [#allocation3]   ;;  %s4584_s11 = scalar_lea.hbm %s5274_s0, 512 }
  0x14   :  { %s18_s8 = sshll.u32 %s4659_s7, 4  ;;  %p4585_p8 = scmp.ne.s32.totalorder %s5274_s0, %s4584_s11  ;;  %s19_s8 = int_to_ptr.vmem [resolvable:$true] %s18_s8 }
  0x15   :  { %p4588_p9 = scmp.lt.u32.totalorder %s4584_s11, %s5274_s0 }
  0x17   :  { %p4590_p10 = pnand %p4588_p9, %p4585_p8 }
  0x19   :  { %4593 = shalt.err (!%p4590_p10)
}
  0x1a   :  { %s4594_s16 = scalar_lea.vmem %s19_s8, 512  ;;  %p4599_p12 = scmp.lt.s32.totalorder %s19_s8, %s19_s8 }
  0x1b   :  { %p4595_p11 = scmp.ne.s32.totalorder %s19_s8, %s4594_s16  ;;  %p4600_p13 = scmp.lt.s32.totalorder %s4594_s16, %s4594_s16 }
  0x1d   :  { %p4601_p0 = por %p4600_p13, %p4599_p12 }
  0x1f   :  { %p4602_p1 = pnand %p4601_p0, %p4595_p11 }
  0x21   :  { %4605 = shalt.err (!%p4602_p1)
}
  0x22   :  { %s4660_s1 = smov 128   ;;  %s4661_s17 = smov 8  }
  0x23   :  { %24 = dma.hbm_to_vmem [thread:$0]  %s5274_s0, 512, %s19_s8, [#allocation4], %s4660_s1, %s4660_s1, %s4661_s17  }
  0x24   :  { %s4662_s20 = smov [#allocation8]   ;;  %s4606_s24 = scalar_lea.hbm %s5278_s4, 2048 }
  0x25   :  { %s46_s21 = sshll.u32 %s4662_s20, 4  ;;  %p4607_p2 = scmp.ne.s32.totalorder %s5278_s4, %s4606_s24  ;;  %s47_s21 = int_to_ptr.vmem [resolvable:$true] %s46_s21 }
  0x26   :  { %p4610_p3 = scmp.lt.u32.totalorder %s4606_s24, %s5278_s4 }
  0x28   :  { %p4612_p4 = pnand %p4610_p3, %p4607_p2 }
  0x2a   :  { %4615 = shalt.err (!%p4612_p4)
}
  0x2b   :  { %s4616_s29 = scalar_lea.vmem %s47_s21, 2048  ;;  %p4621_p6 = scmp.lt.s32.totalorder %s47_s21, %s47_s21 }
  0x2c   :  { %p4617_p5 = scmp.ne.s32.totalorder %s47_s21, %s4616_s29  ;;  %p4622_p7 = scmp.lt.s32.totalorder %s4616_s29, %s4616_s29 }
  0x2e   :  { %p4623_p8 = por %p4622_p7, %p4621_p6 }
  0x30   :  { %p4624_p9 = pnand %p4623_p8, %p4617_p5 }
  0x32   :  { %4627 = shalt.err (!%p4624_p9)
}
  0x33   :  { %52 = dma.hbm_to_vmem [thread:$0]  %s5278_s4, 2048, %s47_s21, [#allocation7], %s4660_s1, %s4660_s1, %s4661_s17  }
  0x34   :  { %4650 = dma.done.wait [#allocation4], 512  }
  0x35   :  { %4651 = vsyncadd [#allocation4], 4294966784 }
  0x36   :  { %4652 = dma.done.wait [#allocation7], 14336  }
  0x37   :  { %4653 = vsyncadd [#allocation7], 4294952960  ;;  %v4663_v0 = vmov 0   ;;  %v4446_v1 = vld [vmem:[#allocation6 + $0x40] sm:$0xff]   ;;  %v4449_v4 = vld [vmem:[#allocation6 + $0x48] sm:$0xff]   ;;  %vm194_vm2 = vcmask 1043456  }
  0x38   :  { %63 = vst [vmem:[#allocation2] sm:$0xf] %v4663_v0  ;;  %64 = vst [vmem:[#allocation2 + $0x4] sm:$0xf] %v4663_v0  ;;  %v4447_v2 = vld [vmem:[#allocation6 + $0x80] sm:$0xff]   ;;  %3417 = vmatprep.subr.bf16.mxu0 %v4446_v1  ;;  %v4450_v5 = vld [vmem:[#allocation6 + $0x88] sm:$0xff]  }
  0x39   :  { %65 = vst [vmem:[#allocation2 + $0x8] sm:$0x1] %v4663_v0  ;;  %66 = vst [vmem:[#allocation2 + $0xc] sm:$0xf] %v4663_v0  ;;  %v4448_v3 = vld [vmem:[#allocation6] sm:$0xff]   ;;  %3745 = vmatprep.subr.bf16.mxu1 %v4447_v2  ;;  %v4451_v6 = vld [vmem:[#allocation6 + $0x8] sm:$0xff]  }
  0x3a   :  { %67 = vst [vmem:[#allocation2 + $0x10] sm:$0xf] %v4663_v0  ;;  %68 = vst [vmem:[#allocation2 + $0x14] sm:$0x1] %v4663_v0  ;;  %3418 = vmatpush3.bf16.msra.mxu0 %v4448_v3  ;;  %3746 = vmatpush3.bf16.msra.mxu1 %v4447_v2  ;;  %v4452_v7 = vld [vmem:[#allocation6 + $0x50] sm:$0xff]   ;;  %v4455_v10 = vld [vmem:[#allocation6 + $0x58] sm:$0xff]  }
  0x3b   :  { %3419 = vmatprep.subr.bf16.mxu0 %v4449_v4  ;;  %3747 = vmatprep.subr.bf16.mxu1 %v4450_v5  ;;  %v4453_v8 = vld [vmem:[#allocation6 + $0x90] sm:$0xff]   ;;  %v4456_v11 = vld [vmem:[#allocation6 + $0x98] sm:$0xff]   ;;  %v4458_v13 = vld [vmem:[#allocation6 + $0x60] sm:$0xff]   ;;  %vm151_vm0 = vsmask.f32 256  ;;  %vm201_vm4 = vcmask 1040384  }
  0x3c   :  { %v4454_v9 = vld [vmem:[#allocation6 + $0x10] sm:$0xff]   ;;  %v4457_v12 = vld [vmem:[#allocation6 + $0x18] sm:$0xff]   ;;  %v4459_v14 = vld [vmem:[#allocation6 + $0xa0] sm:$0xff]   ;;  %vm152_vm1 = vsmask.f32 4368  ;;  %vm278_vm8 = vcmask 1042432  }
  0x3d   :  { %v4460_v15 = vld [vmem:[#allocation6 + $0x20] sm:$0xff]   ;;  %v4461_v16 = vld [vmem:[#allocation6 + $0x68] sm:$0xff]   ;;  %v4464_v19 = vld [vmem:[#allocation6 + $0x70] sm:$0xff]   ;;  %vm195_vm3 = vsmask.f32 7938  ;;  %vm279_vm9 = vcmask 1046532  }
  0x3e   :  { %3420 = vmatpush3.bf16.msra.mxu0 %v4451_v6  ;;  %3748 = vmatpush3.bf16.msra.mxu1 %v4450_v5  ;;  %v4462_v17 = vld [vmem:[#allocation6 + $0xa8] sm:$0xff]   ;;  %v4465_v20 = vld [vmem:[#allocation6 + $0xb0] sm:$0xff]   ;;  %v4467_v22 = vld [vmem:[#allocation6 + $0x78] sm:$0xff]   ;;  %vm219_vm10 = vsmask.f32 3328  ;;  %vm4665_vm14 = vmmov 0  }
  0x3f   :  { %3421 = vmatprep.subr.bf16.mxu0 %v4452_v7  ;;  %3749 = vmatprep.subr.bf16.mxu1 %v4453_v8  ;;  %v4463_v18 = vld [vmem:[#allocation6 + $0x28] sm:$0xff]   ;;  %v4466_v21 = vld [vmem:[#allocation6 + $0x30] sm:$0xff]   ;;  %v85_v23 = vld [vmem:[#allocation3] sm:$0xff]  ;;  %vm220_vm11 = vsmask.f32 7440  ;;  %vm563_vm15 = vcmask 261120  }
  0x40   :  { %v86_v24 = vld [vmem:[#allocation3 + $0x8] sm:$0xff]  ;;  %v4468_v25 = vld [vmem:[#allocation6 + $0xb8] sm:$0xff]   ;;  %v3401_v26 = vpack.c.bf16 %v85_v23, %v85_v23  ;;  %v87_v28 = vld [vmem:[#allocation3 + $0x10] sm:$0xff] }
  0x41   :  { %v3402_v27 = vpack.c.bf16 %v86_v24, %v86_v24  ;;  %v88_v29 = vld [vmem:[#allocation3 + $0x18] sm:$0xff]  ;;  %v3403_v31 = vpack.c.bf16 %v87_v28, %v87_v28  ;;  %vm4743_vm5 = vmor %vm151_vm0, %vm152_vm1  ;;  %v197_v38 = vld [vmem:[#allocation2] sm:$0xf] }
  0x42   :  { %3422 = vmatpush3.bf16.msra.mxu0 %v4454_v9  ;;  %3750 = vmatpush3.bf16.msra.mxu1 %v4453_v8  ;;  %v4469_v30 = vld [vmem:[#allocation6 + $0x38] sm:$0xff]   ;;  %v3404_v32 = vpack.c.bf16 %v88_v29, %v88_v29  ;;  %v155_v33 = vshrl.u32 %v3401_v26, 16  ;;  %v158_v34 = vshll.u32 %v3401_v26, 16  ;;  %v203_v39 = vld [vmem:[#allocation2 + $0x8] sm:$0x1]  ;;  %vm4749_vm6 = vmand %vm194_vm2, %vm195_vm3 }
  0x43   :  { %3423 = vmatprep.subr.bf16.mxu0 %v4455_v10  ;;  %3751 = vmatprep.subr.bf16.mxu1 %v4456_v11  ;;  %v163_v35 = vshrl.u32 %v3402_v27, 16  ;;  %v166_v36 = vshll.u32 %v3402_v27, 16  ;;  %v172_v40 = vshrl.u32 %v3403_v31, 16  ;;  %v175_v41 = vshll.u32 %v3403_v31, 16  ;;  %v206_v47 = vld [vmem:[#allocation2 + $0xc] sm:$0xf]  ;;  %vm4755_vm7 = vmand %vm201_vm4, %vm151_vm0 }
  0x44   :  { %v180_v42 = vshrl.u32 %v3404_v32, 16  ;;  %v183_v43 = vshll.u32 %v3404_v32, 16  ;;  %v157_v44 = vrot.slane %v155_v33, 7  ;;  %v210_v48 = vld [vmem:[#allocation2 + $0x14] sm:$0x1]  ;;  %vm4777_vm12 = vmor %vm278_vm8, %vm279_vm9 }
  0x45   :  { %v165_v45 = vrot.slane %v163_v35, 7  ;;  %v174_v50 = vrot.slane %v172_v40, 7  ;;  %vm4786_vm13 = vmor %vm219_vm10, %vm220_vm11 }
  0x46   :  { %3424 = vmatpush3.bf16.msra.mxu0 %v4457_v12  ;;  %3752 = vmatpush3.bf16.msra.mxu1 %v4456_v11  ;;  %v182_v51 = vrot.slane %v180_v42, 7  ;;  %v160_v52 = vor.u32 %v158_v34, %v157_v44  ;;  %v161_v53 = vrot.slane %v157_v44, 4 }
  0x47   :  { %3425 = vmatprep.subr.bf16.mxu0 %v4458_v13  ;;  %3753 = vmatprep.subr.bf16.mxu1 %v4459_v14  ;;  %v168_v54 = vor.u32 %v166_v36, %v165_v45  ;;  %v170_v55 = vrot.slane %v165_v45, 4  ;;  %v177_v56 = vor.u32 %v175_v41, %v174_v50  ;;  %v178_v57 = vrot.slane %v174_v50, 4 }
  0x48   :  { %v185_v58 = vor.u32 %v183_v43, %v182_v51  ;;  %v187_v59 = vrot.slane %v182_v51, 4  ;;  %v198_v61 = vsel %vm4749_vm6, %v160_v52, %v197_v38 }
  0x49   :  { %v169_v60 = vsel %vm4743_vm5, %v161_v53, %v168_v54  ;;  %v204_v62 = vsel %vm4755_vm7, %v170_v55, %v203_v39  ;;  %199 = vst [vmem:[#allocation2] sm:$0xf] %v198_v61  ;;  %v207_v0 = vsel %vm4749_vm6, %v177_v56, %v206_v47 }
  0x4a   :  { %3426 = vmatpush3.bf16.msra.mxu0 %v4460_v15  ;;  %3754 = vmatpush3.bf16.msra.mxu1 %v4459_v14  ;;  %200 = vst [vmem:[#allocation2 + $0x4] sm:$0xf] %v169_v60  ;;  %205 = vst [vmem:[#allocation2 + $0x8] sm:$0x1] %v204_v62  ;;  %v186_v63 = vsel %vm4743_vm5, %v178_v57, %v185_v58  ;;  %v211_v1 = vsel %vm4755_vm7, %v187_v59, %v210_v48 }
  0x4b   :  { %3427 = vmatprep.subr.bf16.mxu0 %v4461_v16  ;;  %3755 = vmatprep.subr.bf16.mxu1 %v4462_v17  ;;  %208 = vst [vmem:[#allocation2 + $0xc] sm:$0xf] %v207_v0  ;;  %209 = vst [vmem:[#allocation2 + $0x10] sm:$0xf] %v186_v63 }
  0x4c   :  { %212 = vst [vmem:[#allocation2 + $0x14] sm:$0x1] %v211_v1  ;;  %v4664_v1 = vmov 0.0|0.0  }
  0x4e   :  { %3428 = vmatpush3.bf16.msra.mxu0 %v4463_v18  ;;  %3756 = vmatpush3.bf16.msra.mxu1 %v4462_v17 }
  0x4f   :  { %3429 = vmatprep.subr.bf16.mxu0 %v4464_v19  ;;  %3757 = vmatprep.subr.bf16.mxu1 %v4465_v20 }
  0x50   :  { %v4771_v2 = vld [vmem:[#allocation2] sm:$0xf] }
  0x51   :  { %v214_v3 = vld [vmem:[#allocation2 + $0x4] sm:$0xf]  ;;  %v217_v4 = vld [vmem:[#allocation2 + $0x8] sm:$0x1]  ;;  %v223_v5 = vshrl.u32 %v4771_v2, 16  ;;  %v226_v6 = vshll.u32 %v4771_v2, 16 }
  0x52   :  { %3430 = vmatpush3.bf16.msra.mxu0 %v4466_v21  ;;  %3758 = vmatpush3.bf16.msra.mxu1 %v4465_v20  ;;  %v232_v7 = vshll.u32 %v214_v3, 16  ;;  %v236_v8 = vshrl.u32 %v214_v3, 16  ;;  %v270_v9 = vld [vmem:[#allocation2] sm:$0xe]  ;;  %v242_v11 = vshll.u32 %v217_v4, 16  ;;  %v283_v13 = vrot.slane %v214_v3, 5 }
  0x53   :  { %3431 = vmatprep.subr.bf16.mxu0 %v4467_v22  ;;  %3759 = vmatprep.subr.bf16.mxu1 %v4468_v25  ;;  %v3247_v12 = vrot.slane %v270_v9, 9  ;;  %v286_v14 = vrot.slane %v217_v4, 5  ;;  %v216_v15 = vld [vmem:[#allocation2 + $0x10] sm:$0xf]  ;;  %v225_v16 = vrot.slane %v223_v5, 4  ;;  %v228_v17 = vrot.slane %v226_v6, 5 }
  0x54   :  { %v234_v18 = vrot.slane %v232_v7, 5  ;;  %v238_v19 = vrot.slane %v236_v8, 4  ;;  %v218_v20 = vld [vmem:[#allocation2 + $0x14] sm:$0x1]  ;;  %v244_v21 = vrot.slane %v242_v11, 5  ;;  %v285_v23 = vrot.slane %v283_v13, 4 }
  0x55   :  { %v284_v22 = vsel %vm4777_vm12, %v3247_v12, %v283_v13  ;;  %v3249_v24 = vcombine.low %v4771_v2, %v214_v3  ;;  %v215_v26 = vld [vmem:[#allocation2 + $0xc] sm:$0xf]  ;;  %v229_v27 = vor.u32 %v228_v17, %v225_v16  ;;  %v293_v33 = vrot.slane %v218_v20, 5 }
  0x56   :  { %3432 = vmatpush3.bf16.msra.mxu0 %v4469_v30  ;;  %3760 = vmatpush3.bf16.msra.mxu1 %v4468_v25  ;;  %v271_v25 = vld [vmem:[#allocation2 + $0xc] sm:$0xe]  ;;  %v239_v28 = vor.u32 %v238_v19, %v234_v18  ;;  %v290_v30 = vrot.slane %v216_v15, 5  ;;  %v287_v32 = vsel %vm4777_vm12, %v285_v23, %v286_v14  ;;  %v247_v34 = vshrl.u32 %v215_v26, 16 }
  0x57   :  { %v3248_v29 = vrot.slane %v271_v25, 9  ;;  %v250_v35 = vshll.u32 %v215_v26, 16  ;;  %v230_v36 = vrot.slane %v229_v27, 4  ;;  %v3253_v39 = vcombine.low %v284_v22, %v287_v32  ;;  %4193 = vmatprep.subr.bf16.mxu1 %v4664_v1  ;;  %4199 = vmatprep.subr.bf16.mxu0 %v4664_v1 }
  0x58   :  { %v240_v38 = vrot.slane %v239_v28, 4  ;;  %v292_v41 = vrot.slane %v290_v30, 4  ;;  %v249_v42 = vrot.slane %v247_v34, 4  ;;  %v256_v44 = vshll.u32 %v216_v15, 16 }
  0x59   :  { %v291_v40 = vsel %vm4777_vm12, %v3248_v29, %v290_v30  ;;  %v252_v43 = vrot.slane %v250_v35, 5  ;;  %v235_v45 = vsel %vm4786_vm13, %v230_v36, %v234_v18  ;;  %3761 = vmatprep.mubr.bf16.mxu1 %v3253_v39  ;;  %v260_v48 = vshrl.u32 %v216_v15, 16  ;;  %v69_v29 = vld [vmem:[#allocation8] sm:$0xff]  ;;  %v70_v30 = vld [vmem:[#allocation8 + $0x8] sm:$0xff]  ;;  %v72_v39 = vld [vmem:[#allocation8 + $0x18] sm:$0xff] }
  0x5a   :  { %v245_v47 = vsel %vm4786_vm13, %v240_v38, %v244_v21  ;;  %v266_v50 = vshll.u32 %v218_v20, 16  ;;  %v294_v52 = vsel %vm4777_vm12, %v292_v41, %v293_v33  ;;  %v258_v54 = vrot.slane %v256_v44, 5  ;;  %v71_v38 = vld [vmem:[#allocation8 + $0x10] sm:$0xff] }
  0x5b   :  { %v3251_v51 = vcombine.low %v235_v45, %v245_v47  ;;  %v253_v53 = vor.u32 %v252_v43, %v249_v42  ;;  %v3254_v55 = vcombine.low %v291_v40, %v294_v52  ;;  %v262_v56 = vrot.slane %v260_v48, 4  ;;  %v73_v42 = vld [vmem:[#allocation8 + $0x20] sm:$0xff]  ;;  %v74_v43 = vld [vmem:[#allocation8 + $0x28] sm:$0xff]  ;;  %v75_v45 = vld [vmem:[#allocation8 + $0x30] sm:$0xff] }
  0x5c   :  { %v268_v58 = vrot.slane %v266_v50, 5  ;;  %v3250_v63 = vcombine.low %v215_v26, %v216_v15  ;;  %v4666_v3 = vmov 0.0   ;;  %v4832_v36 = vpack.c.bf16 %v70_v30, %v69_v29  ;;  %v76_v47 = vld [vmem:[#allocation8 + $0x38] sm:$0xff]  ;;  %v77_v50 = vld [vmem:[#allocation8 + $0x40] sm:$0xff]  ;;  %v4491_v29 = vld [vmem:[#allocation6 + $0x130] sm:$0xff]  }
  0x5d   :  { %497 = vmatprep.mubr.bf16.mxu0 %v3251_v51  ;;  %v254_v57 = vrot.slane %v253_v53, 4  ;;  %3762 = vmatmul.mubr.bf16.vlgmr.msra.gmra.mrb[0].mxu1 %v3254_v55  ;;  %v263_v59 = vor.u32 %v262_v56, %v258_v54  ;;  %v4667_v40 = vmov 1.0   ;;  %v4839_v41 = vpack.c.bf16 %v72_v39, %v71_v38  ;;  %v78_v51 = vld [vmem:[#allocation8 + $0x48] sm:$0xff]  ;;  %v79_v53 = vld [vmem:[#allocation8 + $0x50] sm:$0xff]  ;;  %v81_v56 = vld [vmem:[#allocation8 + $0x60] sm:$0xff] }
  0x5e   :  { %498 = vmatmul.mubr.bf16.vlgmr.msra.gmra.mrb[0].mxu0 %v3249_v24  ;;  %3773 = vmatprep.mubr.msk.f32.mxu1 %vm4665_vm14, %v4666_v3  ;;  %v4851_v44 = vpack.c.bf16 %v74_v43, %v73_v42  ;;  %v4857_v48 = vpack.c.bf16 %v76_v47, %v75_v45  ;;  %v4863_v52 = vpack.c.bf16 %v78_v51, %v77_v50  ;;  %v4492_v30 = vld [vmem:[#allocation6 + $0x178] sm:$0xff]  }
  0x5f   :  { %v259_v60 = vsel %vm4786_vm13, %v254_v57, %v258_v54  ;;  %v264_v61 = vrot.slane %v263_v59, 4  ;;  %v80_v54 = vld [vmem:[#allocation8 + $0x58] sm:$0xff]  ;;  %v82_v57 = vld [vmem:[#allocation8 + $0x68] sm:$0xff]  ;;  %v83_v59 = vld [vmem:[#allocation8 + $0x70] sm:$0xff] }
  0x60   :  { %v4869_v55 = vpack.c.bf16 %v80_v54, %v79_v53  ;;  %v861_v53 = vlaneseq }
  0x61   :  { %v269_v62 = vsel %vm4786_vm13, %v264_v61, %v268_v58  ;;  %v4875_v58 = vpack.c.bf16 %v82_v57, %v81_v56  ;;  %v137_v56 = vld [vmem:[%s5276_s2] sm:$0x1] }
  0x62   :  { %v3252_v0 = vcombine.low %v259_v60, %v269_v62  ;;  %v84_v60 = vld [vmem:[#allocation8 + $0x78] sm:$0xff]  ;;  %v862_v54 = vshrl.u32 %v861_v53, 7 }
  0x63   :  { %v4881_v61 = vpack.c.bf16 %v84_v60, %v83_v59 }
  0x64   :  { %505 = vmatprep.mubr.bf16.mxu0 %v3252_v0  ;;  %v4893_v57 = vsub.s32 0, %v862_v54 }
  0x66   :  { %506 = vmatmul.mubr.bf16.gmra.mrb[4].mxu0 %v3250_v63 }
  0x67   :  { %3784 = vmatprep.mubr.msk.f32.mxu0 %vm4665_vm14, %v4666_v3 }
 0x130   :  { %v3763_v5 = vpop.f32.mrb[0].mxu1 }
 0x131   :  { %v3433_v4 = vpop.f32.mrb[0].mxu0  ;;  %v548_v7 = vpop.f32.mrb[1].mxu1 }
 0x132   :  { %v3434_v6 = vpop.f32.mrb[1].mxu0  ;;  %v3764_v11 = vpop.f32.mrb[2].mxu1 }
 0x133   :  { %v3435_v8 = vadd.f32 %v3434_v6, %v3433_v4  ;;  %v3436_v9 = vpop.f32.mrb[2].mxu0  ;;  %v551_v13 = vpop.f32.mrb[3].mxu1  ;;  %v4473_v6 = vld [vmem:[#allocation6 + $0x100] sm:$0xff]  }
 0x134   :  { %v3437_v12 = vpop.f32.mrb[3].mxu0 }
 0x135   :  { %v4810_v14 = vadd.f32 %v3435_v8, %v548_v7  ;;  %v3438_v15 = vadd.f32 %v3437_v12, %v3436_v9  ;;  %v4474_v7 = vld [vmem:[#allocation6 + $0x148] sm:$0xff]   ;;  %v4475_v8 = vld [vmem:[#allocation6 + $0xc0] sm:$0xff]  }
 0x136   :  { %v4476_v9 = vld [vmem:[#allocation6 + $0x108] sm:$0xff]  }
 0x137   :  { %v4812_v16 = vadd.f32 %v3438_v15, %v551_v13  ;;  %v637_v17 = vmul.f32 %v4810_v14, %v4810_v14  ;;  %v4478_v12 = vld [vmem:[#allocation6 + $0xc8] sm:$0xff]   ;;  %v4479_v13 = vld [vmem:[#allocation6 + $0x110] sm:$0xff]   ;;  %v4480_v15 = vld [vmem:[#allocation6 + $0x158] sm:$0xff]  }
 0x139   :  { %v4194_v18 = vpack.c.bf16 %v4812_v16, %v4810_v14  ;;  %v638_v19 = vmul.f32 %v4812_v16, %v4812_v16  ;;  %v3439_v20 = vpop.f32.mrb[4].mxu0 }
 0x13a   :  { %v3440_v21 = vpop.f32.mrb[5].mxu0 }
 0x13b   :  { %v4200_v22 = vpack.c.bf16 %v638_v19, %v637_v17  ;;  %v3441_v23 = vadd.f32 %v3440_v21, %v3439_v20  ;;  %v3442_v24 = vpop.f32.mrb[6].mxu0  ;;  %4195 = vmatpush3.bf16.msra.mxu1 %v4194_v18  ;;  %v4481_v17 = vld [vmem:[#allocation6 + $0xd0] sm:$0xff]   ;;  %v4482_v18 = vld [vmem:[#allocation6 + $0x118] sm:$0xff]   ;;  %v4483_v19 = vld [vmem:[#allocation6 + $0x160] sm:$0xff]  }
 0x13c   :  { %v3443_v25 = vpop.f32.mrb[7].mxu0  ;;  %4196 = vmatprep.subr.bf16.mxu1 %v4664_v1  ;;  %v4484_v20 = vld [vmem:[#allocation6 + $0xd8] sm:$0xff]   ;;  %v4485_v21 = vld [vmem:[#allocation6 + $0x120] sm:$0xff]  }
 0x13d   :  { %v4821_v26 = vadd.f32 %v3763_v5, %v3441_v23  ;;  %v3444_v27 = vadd.f32 %v3443_v25, %v3442_v24  ;;  %4201 = vmatpush3.bf16.msra.mxu0 %v4200_v22  ;;  %v4472_v5 = vld [vmem:[#allocation6 + $0x140] sm:$0xff]   ;;  %v4486_v22 = vld [vmem:[#allocation6 + $0x168] sm:$0xff]   ;;  %v4489_v25 = vld [vmem:[#allocation6 + $0x170] sm:$0xff]  }
 0x13e   :  { %4202 = vmatprep.subr.bf16.mxu0 %v4664_v1  ;;  %v4487_v23 = vld [vmem:[#allocation6 + $0xe0] sm:$0xff]   ;;  %v4488_v24 = vld [vmem:[#allocation6 + $0x128] sm:$0xff]  }
 0x13f   :  { %v4824_v28 = vadd.f32 %v3764_v11, %v3444_v27  ;;  %v639_v32 = vmul.f32 %v4821_v26, %v4821_v26  ;;  %v4477_v11 = vld [vmem:[#allocation6 + $0x150] sm:$0xff]   ;;  %v4490_v27 = vld [vmem:[#allocation6 + $0xe8] sm:$0xff]  }
 0x141   :  { %v4197_v33 = vpack.c.bf16 %v4824_v28, %v4821_v26  ;;  %v640_v34 = vmul.f32 %v4824_v28, %v4824_v28 }
 0x143   :  { %4198 = vmatpush3.bf16.msra.mxu1 %v4197_v33  ;;  %v4203_v35 = vpack.c.bf16 %v640_v34, %v639_v32  ;;  %v4493_v32 = vld [vmem:[#allocation6 + $0xf0] sm:$0xff]   ;;  %v4494_v33 = vld [vmem:[#allocation6 + $0x138] sm:$0xff]  }
 0x144   :  { %4205 = vmatprep.subr.bf16.mxu1 %v4664_v1  ;;  %v4495_v34 = vld [vmem:[#allocation6 + $0xf8] sm:$0xff]  }
 0x145   :  { %4204 = vmatpush3.bf16.msra.mxu0 %v4203_v35 }
 0x146   :  { %3774 = vmatmul.mubr.msk.f32.vlgmr.msra.gmra.mrb[4].mxu1 %vm563_vm15, %v4667_v40  ;;  %4229 = vmatprep.subr.bf16.mxu0 %v4664_v1 }
 0x147   :  { %4207 = vmatpush3.bf16.msra.mxu1 %v4832_v36  ;;  %3819 = vmatprep.mubr.msk.f32.mxu1 %vm4665_vm14, %v4666_v3 }
 0x148   :  { %3785 = vmatmul.mubr.msk.f32.vlgmr.msra.gmra.mrb[8].mxu0 %vm563_vm15, %v4667_v40  ;;  %4208 = vmatprep.subr.bf16.mxu1 %v4664_v1 }
 0x149   :  { %4231 = vmatpush3.bf16.msra.mxu0 %v4832_v36  ;;  %3854 = vmatprep.mubr.msk.f32.mxu0 %vm4665_vm14, %v4666_v3 }
 0x14a   :  { %4232 = vmatprep.subr.bf16.mxu0 %v4664_v1 }
 0x14b   :  { %4210 = vmatpush3.bf16.msra.mxu1 %v4839_v41 }
 0x14c   :  { %4211 = vmatprep.subr.bf16.mxu1 %v4664_v1 }
 0x14d   :  { %4234 = vmatpush3.bf16.msra.mxu0 %v4839_v41 }
 0x14e   :  { %4235 = vmatprep.subr.bf16.mxu0 %v4664_v1 }
 0x14f   :  { %4213 = vmatpush3.bf16.msra.mxu1 %v4851_v44 }
 0x150   :  { %4214 = vmatprep.subr.bf16.mxu1 %v4664_v1 }
 0x151   :  { %4237 = vmatpush3.bf16.msra.mxu0 %v4851_v44 }
 0x152   :  { %4238 = vmatprep.subr.bf16.mxu0 %v4664_v1 }
 0x153   :  { %4216 = vmatpush3.bf16.msra.mxu1 %v4857_v48 }
 0x154   :  { %4217 = vmatprep.subr.bf16.mxu1 %v4664_v1 }
 0x155   :  { %4240 = vmatpush3.bf16.msra.mxu0 %v4857_v48 }
 0x156   :  { %4241 = vmatprep.subr.bf16.mxu0 %v4664_v1 }
 0x157   :  { %4219 = vmatpush3.bf16.msra.mxu1 %v4863_v52 }
 0x158   :  { %4220 = vmatprep.subr.bf16.mxu1 %v4664_v1 }
 0x159   :  { %4243 = vmatpush3.bf16.msra.mxu0 %v4863_v52 }
 0x15a   :  { %4244 = vmatprep.subr.bf16.mxu0 %v4664_v1 }
 0x15b   :  { %4222 = vmatpush3.bf16.msra.mxu1 %v4869_v55 }
 0x15c   :  { %4223 = vmatprep.subr.bf16.mxu1 %v4664_v1 }
 0x15d   :  { %4246 = vmatpush3.bf16.msra.mxu0 %v4869_v55 }
 0x15e   :  { %4247 = vmatprep.subr.bf16.mxu0 %v4664_v1 }
 0x15f   :  { %4225 = vmatpush3.bf16.msra.mxu1 %v4875_v58 }
 0x160   :  { %4226 = vmatprep.subr.bf16.mxu1 %v4664_v1 }
 0x161   :  { %4249 = vmatpush3.bf16.msra.mxu0 %v4875_v58 }
 0x162   :  { %4250 = vmatprep.subr.bf16.mxu0 %v4664_v1 }
 0x163   :  { %4228 = vmatpush3.bf16.msra.mxu1 %v4881_v61 }
 0x164   :  { %3499 = vmatprep.subr.bf16.mxu1 %v4473_v6 }
 0x165   :  { %4252 = vmatpush3.bf16.msra.mxu0 %v4881_v61 }
 0x166   :  { %3857 = vmatprep.subr.bf16.mxu0 %v4472_v5 }
 0x219   :  { %v633_v62 = vpop.f32.mrb[4].mxu1 }
 0x21a   :  { %v3775_v63 = vpop.f32.mrb[5].mxu1  ;;  %3820 = vmatmul.mubr.f32.vlgmr.msra.gmra.mrb[6].mxu1 %v633_v62  ;;  %v138_v62 = vld [vmem:[%s5277_s3] sm:$0x1] }
 0x21b   :  { %v707_v0 = vpop.f32.mrb[8].mxu0  ;;  %3500 = vmatpush3.bf16.msra.mxu1 %v4475_v8 }
 0x21c   :  { %v3786_v4 = vpop.f32.mrb[9].mxu0  ;;  %3855 = vmatmul.mubr.f32.vlgmr.msra.gmra.mrb[10].mxu0 %v707_v0  ;;  %3501 = vmatprep.subr.bf16.mxu1 %v4476_v9 }
 0x21d   :  { %3858 = vmatpush3.bf16.msra.mxu0 %v4472_v5 }
 0x21e   :  { %3859 = vmatprep.subr.bf16.mxu0 %v4474_v7 }
 0x21f   :  { %3502 = vmatpush3.bf16.msra.mxu1 %v4478_v12 }
 0x220   :  { %3503 = vmatprep.subr.bf16.mxu1 %v4479_v13 }
 0x221   :  { %3860 = vmatpush3.bf16.msra.mxu0 %v4474_v7 }
 0x222   :  { %3861 = vmatprep.subr.bf16.mxu0 %v4477_v11 }
 0x223   :  { %3504 = vmatpush3.bf16.msra.mxu1 %v4481_v17 }
 0x224   :  { %3505 = vmatprep.subr.bf16.mxu1 %v4482_v18 }
 0x225   :  { %3862 = vmatpush3.bf16.msra.mxu0 %v4477_v11 }
 0x226   :  { %3863 = vmatprep.subr.bf16.mxu0 %v4480_v15 }
 0x227   :  { %3506 = vmatpush3.bf16.msra.mxu1 %v4484_v20 }
 0x228   :  { %3507 = vmatprep.subr.bf16.mxu1 %v4485_v21 }
 0x229   :  { %3864 = vmatpush3.bf16.msra.mxu0 %v4480_v15 }
 0x22a   :  { %3865 = vmatprep.subr.bf16.mxu0 %v4483_v19 }
 0x22b   :  { %3508 = vmatpush3.bf16.msra.mxu1 %v4487_v23 }
 0x22c   :  { %3509 = vmatprep.subr.bf16.mxu1 %v4488_v24 }
 0x22d   :  { %3866 = vmatpush3.bf16.msra.mxu0 %v4483_v19 }
 0x22e   :  { %3867 = vmatprep.subr.bf16.mxu0 %v4486_v22 }
 0x22f   :  { %3510 = vmatpush3.bf16.msra.mxu1 %v4490_v27 }
 0x230   :  { %3511 = vmatprep.subr.bf16.mxu1 %v4491_v29 }
 0x231   :  { %3868 = vmatpush3.bf16.msra.mxu0 %v4486_v22 }
 0x232   :  { %3869 = vmatprep.subr.bf16.mxu0 %v4489_v25 }
 0x233   :  { %3512 = vmatpush3.bf16.msra.mxu1 %v4493_v32 }
 0x234   :  { %3513 = vmatprep.subr.bf16.mxu1 %v4494_v33 }
 0x235   :  { %3870 = vmatpush3.bf16.msra.mxu0 %v4489_v25 }
 0x236   :  { %3871 = vmatprep.subr.bf16.mxu0 %v4492_v30 }
 0x237   :  { %3514 = vmatpush3.bf16.msra.mxu1 %v4495_v34 }
 0x238   :  { %4259 = vmatprep.subr.bf16.mxu1 %v4664_v1 }
 0x239   :  { %3872 = vmatpush3.bf16.msra.mxu0 %v4492_v30 }
 0x23a   :  { %4253 = vmatprep.subr.bf16.mxu0 %v4664_v1 }
 0x2ed   :  { %v777_v35 = vpop.f32.mrb[6].mxu1 }
 0x2ee   :  { %v781_v38 = vmul.f32 0.001953125, %v777_v35  ;;  %v3821_v39 = vpop.f32.mrb[7].mxu1 }
 0x2ef   :  { %v848_v42 = vpop.f32.mrb[10].mxu0 }
 0x2f0   :  { %v853_v43 = vmul.f32 %v781_v38, %v781_v38  ;;  %v852_v45 = vmul.f32 0.001953125, %v848_v42  ;;  %v3856_v47 = vpop.f32.mrb[11].mxu0 }
 0x2f1   :  { %v995_v47 = vld [vmem:[#allocation2 + $0xc] sm:$0xf] }
 0x2f2   :  { %v854_v50 = vsub.f32 %v852_v45, %v853_v43 }
 0x2f4   :  { %v855_v51 = vadd.f32 1e-05, %v854_v50  ;;  %v999_v50 = vld [vmem:[#allocation2 + $0x14] sm:$0x1] }
 0x2f6   :  { %4550 = vrsqrt.f32 %v855_v51 }
 0x300   :  { %v4551_v59 = vpop.eup %4550 }
 0x301   :  { %v857_v60 = vmul.f32 %v4551_v59, %v137_v56 }
 0x303   :  { %v858_v63 = vmul.f32 %v857_v60, %v781_v38  ;;  %v864_v0 = vrot.slane %v857_v60, %v4893_v57  ;;  %v992_v38 = vld [vmem:[#allocation2 + $0x8] sm:$0x1] }
 0x305   :  { %v859_v4 = vsub.f32 %v138_v62, %v858_v63  ;;  %v866_v5 = vmul.f32 %v864_v0, %v4810_v14  ;;  %v867_v6 = vmul.f32 %v864_v0, %v4812_v16  ;;  %v868_v7 = vmul.f32 %v864_v0, %v4821_v26 }
 0x306   :  { %v869_v8 = vmul.f32 %v864_v0, %v4824_v28 }
 0x307   :  { %v874_v9 = vrot.slane %v859_v4, %v4893_v57 }
 0x309   :  { %v876_v11 = vadd.f32 %v874_v9, %v866_v5  ;;  %v877_v12 = vadd.f32 %v874_v9, %v867_v6  ;;  %v878_v13 = vadd.f32 %v874_v9, %v868_v7  ;;  %v879_v15 = vadd.f32 %v874_v9, %v869_v8 }
 0x30b   :  { %v880_v17 = vmax.f32 %v876_v11, 0.0  ;;  %v881_v18 = vmax.f32 %v877_v12, 0.0  ;;  %v882_v19 = vmax.f32 %v878_v13, 0.0  ;;  %v883_v20 = vmax.f32 %v879_v15, 0.0 }
 0x30d   :  { %v3405_v21 = vpack.c.bf16 %v880_v17, %v880_v17  ;;  %v3406_v22 = vpack.c.bf16 %v881_v18, %v881_v18  ;;  %v3407_v23 = vpack.c.bf16 %v882_v19, %v882_v19  ;;  %v3408_v14 = vpack.c.bf16 %v883_v20, %v883_v20 }
 0x30f   :  { %v950_v24 = vshrl.u32 %v3405_v21, 16  ;;  %v958_v16 = vshrl.u32 %v3406_v22, 16  ;;  %v967_v25 = vshrl.u32 %v3407_v23, 16  ;;  %v975_v26 = vshrl.u32 %v3408_v14, 16 }
 0x310   :  { %v953_v28 = vshll.u32 %v3405_v21, 16  ;;  %v961_v30 = vshll.u32 %v3406_v22, 16  ;;  %v970_v33 = vshll.u32 %v3407_v23, 16  ;;  %v978_v35 = vshll.u32 %v3408_v14, 16 }
 0x311   :  { %v952_v27 = vrot.slane %v950_v24, 7  ;;  %v960_v29 = vrot.slane %v958_v16, 7  ;;  %v969_v32 = vrot.slane %v967_v25, 7  ;;  %v977_v34 = vrot.slane %v975_v26, 7 }
 0x313   :  { %v955_v39 = vor.u32 %v953_v28, %v952_v27  ;;  %v956_v42 = vrot.slane %v952_v27, 4  ;;  %v963_v43 = vor.u32 %v961_v30, %v960_v29  ;;  %v965_v45 = vrot.slane %v960_v29, 4 }
 0x314   :  { %v972_v51 = vor.u32 %v970_v33, %v969_v32  ;;  %v973_v53 = vrot.slane %v969_v32, 4  ;;  %v980_v54 = vor.u32 %v978_v35, %v977_v34  ;;  %v982_v56 = vrot.slane %v977_v34, 4 }
 0x315   :  { %v964_v59 = vsel %vm4743_vm5, %v956_v42, %v963_v43  ;;  %v989_v60 = vsel %vm4749_vm6, %v955_v39, %v4771_v2  ;;  %v993_v62 = vsel %vm4755_vm7, %v965_v45, %v992_v38 }
 0x316   :  { %v981_v63 = vsel %vm4743_vm5, %v973_v53, %v980_v54  ;;  %991 = vst [vmem:[#allocation2 + $0x4] sm:$0xf] %v964_v59  ;;  %v996_v0 = vsel %vm4749_vm6, %v972_v51, %v995_v47  ;;  %v1000_v4 = vsel %vm4755_vm7, %v982_v56, %v999_v50  ;;  %990 = vst [vmem:[#allocation2] sm:$0xf] %v989_v60 }
 0x317   :  { %994 = vst [vmem:[#allocation2 + $0x8] sm:$0x1] %v993_v62  ;;  %998 = vst [vmem:[#allocation2 + $0x10] sm:$0xf] %v981_v63 }
 0x318   :  { %1001 = vst [vmem:[#allocation2 + $0x14] sm:$0x1] %v1000_v4  ;;  %997 = vst [vmem:[#allocation2 + $0xc] sm:$0xf] %v996_v0 }
 0x31d   :  { %v1003_v5 = vld [vmem:[#allocation2 + $0x4] sm:$0xf]  ;;  %v1056_v6 = vld [vmem:[#allocation2] sm:$0xe] }
 0x31e   :  { %v1006_v2 = vld [vmem:[#allocation2 + $0x8] sm:$0x1]  ;;  %v3287_v7 = vrot.slane %v1056_v6, 9  ;;  %v1066_v8 = vrot.slane %v1003_v5, 5  ;;  %v1005_v11 = vld [vmem:[#allocation2 + $0x10] sm:$0xf] }
 0x31f   :  { %v1069_v9 = vrot.slane %v1006_v2, 5  ;;  %v1018_v12 = vshll.u32 %v1003_v5, 16  ;;  %v1007_v13 = vld [vmem:[#allocation2 + $0x14] sm:$0x1]  ;;  %v1057_v15 = vld [vmem:[#allocation2 + $0xc] sm:$0xe] }
 0x320   :  { %v1073_v17 = vrot.slane %v1005_v11, 5  ;;  %v1022_v18 = vshrl.u32 %v1003_v5, 16  ;;  %v1067_v19 = vsel %vm4777_vm12, %v3287_v7, %v1066_v8  ;;  %v1068_v20 = vrot.slane %v1066_v8, 4  ;;  %v4919_v23 = vld [vmem:[#allocation2] sm:$0xf] }
 0x321   :  { %v3288_v21 = vrot.slane %v1057_v15, 9  ;;  %v1076_v22 = vrot.slane %v1007_v13, 5  ;;  %v1009_v24 = vshrl.u32 %v4919_v23, 16  ;;  %v1012_v16 = vshll.u32 %v4919_v23, 16  ;;  %v1004_v30 = vld [vmem:[#allocation2 + $0xc] sm:$0xf] }
 0x322   :  { %v1075_v14 = vrot.slane %v1073_v17, 4  ;;  %v1020_v25 = vrot.slane %v1018_v12, 5  ;;  %v1070_v26 = vsel %vm4777_vm12, %v1068_v20, %v1069_v9  ;;  %v1024_v28 = vrot.slane %v1022_v18, 4 }
 0x323   :  { %v1074_v27 = vsel %vm4777_vm12, %v3288_v21, %v1073_v17  ;;  %v1028_v29 = vshll.u32 %v1006_v2, 16  ;;  %v3293_v32 = vcombine.low %v1067_v19, %v1070_v26  ;;  %v1011_v34 = vrot.slane %v1009_v24, 4 }
 0x324   :  { %v1077_v33 = vsel %vm4777_vm12, %v1075_v14, %v1076_v22  ;;  %v1014_v35 = vrot.slane %v1012_v16, 5  ;;  %v1025_v39 = vor.u32 %v1024_v28, %v1020_v25  ;;  %v1033_v43 = vshrl.u32 %v1004_v30, 16 }
 0x325   :  { %v3294_v38 = vcombine.low %v1074_v27, %v1077_v33  ;;  %3873 = vmatprep.mubr.bf16.mxu0 %v3293_v32  ;;  %v1036_v45 = vshll.u32 %v1004_v30, 16  ;;  %v1042_v47 = vshll.u32 %v1005_v11, 16  ;;  %v1030_v51 = vrot.slane %v1028_v29, 5 }
 0x326   :  { %v1015_v42 = vor.u32 %v1014_v35, %v1011_v34  ;;  %v1026_v50 = vrot.slane %v1025_v39, 4  ;;  %v1046_v53 = vshrl.u32 %v1005_v11, 16  ;;  %v1035_v56 = vrot.slane %v1033_v43, 4 }
 0x327   :  { %3874 = vmatmul.mubr.bf16.vlgmr.msra.gmra.mrb[12].mxu0 %v3294_v38  ;;  %v1038_v59 = vrot.slane %v1036_v45, 5  ;;  %v1044_v60 = vrot.slane %v1042_v47, 5  ;;  %v1052_v0 = vshll.u32 %v1007_v13, 16  ;;  %v3289_v8 = vcombine.low %v4919_v23, %v1003_v5 }
 0x328   :  { %v1016_v54 = vrot.slane %v1015_v42, 4  ;;  %3885 = vmatprep.mubr.msk.f32.mxu0 %vm4665_vm14, %v4666_v3  ;;  %v1031_v62 = vsel %vm4786_vm13, %v1026_v50, %v1030_v51  ;;  %v1048_v63 = vrot.slane %v1046_v53, 4  ;;  %v3290_v19 = vcombine.low %v1004_v30, %v1005_v11 }
 0x329   :  { %v1039_v2 = vor.u32 %v1038_v59, %v1035_v56  ;;  %v1054_v15 = vrot.slane %v1052_v0, 5  ;;  %v4499_v0 = vld [vmem:[#allocation6 + $0x1c0] sm:$0xff]  }
 0x32a   :  { %v1021_v4 = vsel %vm4786_vm13, %v1016_v54, %v1020_v25  ;;  %v1049_v7 = vor.u32 %v1048_v63, %v1044_v60  ;;  %v4498_v63 = vld [vmem:[#allocation6 + $0x200] sm:$0xff]  }
 0x32b   :  { %v3291_v6 = vcombine.low %v1021_v4, %v1031_v62  ;;  %v1040_v9 = vrot.slane %v1039_v2, 4  ;;  %v4500_v4 = vld [vmem:[#allocation6 + $0x208] sm:$0xff]   ;;  %v4501_v2 = vld [vmem:[#allocation6 + $0x180] sm:$0xff]  }
 0x32c   :  { %v1050_v12 = vrot.slane %v1049_v7, 4  ;;  %v4503_v7 = vld [vmem:[#allocation6 + $0x210] sm:$0xff]  }
 0x32d   :  { %1280 = vmatprep.mubr.bf16.mxu1 %v3291_v6  ;;  %v1045_v17 = vsel %vm4786_vm13, %v1040_v9, %v1044_v60  ;;  %v4502_v6 = vld [vmem:[#allocation6 + $0x1c8] sm:$0xff]   ;;  %v4505_v9 = vld [vmem:[#allocation6 + $0x1d0] sm:$0xff]  }
 0x32e   :  { %1281 = vmatmul.mubr.bf16.vlgmr.msra.gmra.mrb[8].mxu1 %v3289_v8  ;;  %v1055_v18 = vsel %vm4786_vm13, %v1050_v12, %v1054_v15  ;;  %v4504_v8 = vld [vmem:[#allocation6 + $0x188] sm:$0xff]   ;;  %v4506_v12 = vld [vmem:[#allocation6 + $0x218] sm:$0xff]   ;;  %v4507_v15 = vld [vmem:[#allocation6 + $0x190] sm:$0xff]  }
 0x32f   :  { %v3292_v13 = vcombine.low %v1045_v17, %v1055_v18  ;;  %v4508_v17 = vld [vmem:[#allocation6 + $0x1d8] sm:$0xff]   ;;  %v4509_v18 = vld [vmem:[#allocation6 + $0x220] sm:$0xff]  }
 0x331   :  { %1288 = vmatprep.mubr.bf16.mxu1 %v3292_v13  ;;  %v4510_v13 = vld [vmem:[#allocation6 + $0x198] sm:$0xff]  }
 0x336   :  { %1289 = vmatmul.mubr.bf16.gmra.mrb[12].mxu1 %v3290_v19  ;;  %v4511_v19 = vld [vmem:[#allocation6 + $0x1e0] sm:$0xff]  }
 0x337   :  { %3896 = vmatprep.mubr.msk.f32.mxu1 %vm4665_vm14, %v4666_v3 }
 0x3fa   :  { %v3875_v20 = vpop.f32.mrb[12].mxu0 }
 0x3fb   :  { %v1331_v5 = vpop.f32.mrb[13].mxu0 }
 0x3fc   :  { %v3876_v21 = vpop.f32.mrb[14].mxu0 }
 0x3fd   :  { %v1334_v22 = vpop.f32.mrb[15].mxu0 }
 0x401   :  { %v3515_v14 = vpop.f32.mrb[8].mxu1 }
 0x402   :  { %v3516_v24 = vpop.f32.mrb[9].mxu1 }
 0x403   :  { %v3517_v16 = vadd.f32 %v3516_v24, %v3515_v14  ;;  %v3518_v25 = vpop.f32.mrb[10].mxu1  ;;  %v4516_v14 = vld [vmem:[#allocation6 + $0x1a8] sm:$0xff]   ;;  %v4517_v24 = vld [vmem:[#allocation6 + $0x1f0] sm:$0xff]  }
 0x404   :  { %v3519_v26 = vpop.f32.mrb[11].mxu1 }
 0x405   :  { %v4942_v27 = vadd.f32 %v3517_v16, %v1331_v5  ;;  %v3520_v28 = vadd.f32 %v3519_v26, %v3518_v25  ;;  %v4513_v5 = vld [vmem:[#allocation6 + $0x1a0] sm:$0xff]   ;;  %v4518_v16 = vld [vmem:[#allocation6 + $0x238] sm:$0xff]   ;;  %v4519_v25 = vld [vmem:[#allocation6 + $0x1b0] sm:$0xff]  }
 0x406   :  { %v4520_v26 = vld [vmem:[#allocation6 + $0x1f8] sm:$0xff]  }
 0x407   :  { %v4944_v29 = vadd.f32 %v3520_v28, %v1334_v22  ;;  %v1416_v11 = vmul.f32 %v4942_v27, %v4942_v27  ;;  %v4515_v22 = vld [vmem:[#allocation6 + $0x230] sm:$0xff]   ;;  %v4521_v28 = vld [vmem:[#allocation6 + $0x1b8] sm:$0xff]  }
 0x409   :  { %v4254_v30 = vpack.c.bf16 %v4944_v29, %v4942_v27  ;;  %v1417_v32 = vmul.f32 %v4944_v29, %v4944_v29  ;;  %v3521_v33 = vpop.f32.mrb[12].mxu1 }
 0x40a   :  { %v3522_v34 = vpop.f32.mrb[13].mxu1 }
 0x40b   :  { %v3523_v35 = vadd.f32 %v3522_v34, %v3521_v33  ;;  %v3524_v38 = vpop.f32.mrb[14].mxu1  ;;  %4255 = vmatpush3.bf16.msra.mxu0 %v4254_v30  ;;  %v4260_v39 = vpack.c.bf16 %v1417_v32, %v1416_v11 }
 0x40c   :  { %v3525_v42 = vpop.f32.mrb[15].mxu1  ;;  %4256 = vmatprep.subr.bf16.mxu0 %v4664_v1 }
 0x40d   :  { %v4953_v43 = vadd.f32 %v3875_v20, %v3523_v35  ;;  %v3526_v45 = vadd.f32 %v3525_v42, %v3524_v38  ;;  %4261 = vmatpush3.bf16.msra.mxu1 %v4260_v39  ;;  %v4512_v20 = vld [vmem:[#allocation6 + $0x228] sm:$0xff]  }
 0x40e   :  { %4262 = vmatprep.subr.bf16.mxu1 %v4664_v1 }
 0x40f   :  { %v4956_v47 = vadd.f32 %v3876_v21, %v3526_v45  ;;  %v1418_v50 = vmul.f32 %v4953_v43, %v4953_v43  ;;  %v4514_v21 = vld [vmem:[#allocation6 + $0x1e8] sm:$0xff]  }
 0x410   :  { %v3281_v45 = vld [vmem:[%s5276_s2 + $0x1] sm:$0x1] }
 0x411   :  { %v4257_v51 = vpack.c.bf16 %v4956_v47, %v4953_v43  ;;  %v1419_v53 = vmul.f32 %v4956_v47, %v4956_v47 }
 0x413   :  { %4258 = vmatpush3.bf16.msra.mxu0 %v4257_v51  ;;  %v4263_v54 = vpack.c.bf16 %v1419_v53, %v1418_v50  ;;  %v3282_v53 = vld [vmem:[%s5277_s3 + $0x1] sm:$0x1] }
 0x414   :  { %4265 = vmatprep.subr.bf16.mxu0 %v4664_v1 }
 0x415   :  { %4264 = vmatpush3.bf16.msra.mxu1 %v4263_v54 }
 0x416   :  { %3886 = vmatmul.mubr.msk.f32.vlgmr.msra.gmra.mrb[16].mxu0 %vm563_vm15, %v4667_v40  ;;  %4289 = vmatprep.subr.bf16.mxu1 %v4664_v1 }
 0x417   :  { %4267 = vmatpush3.bf16.msra.mxu0 %v4832_v36  ;;  %3931 = vmatprep.mubr.msk.f32.mxu0 %vm4665_vm14, %v4666_v3 }
 0x418   :  { %3897 = vmatmul.mubr.msk.f32.vlgmr.msra.gmra.mrb[16].mxu1 %vm563_vm15, %v4667_v40  ;;  %4268 = vmatprep.subr.bf16.mxu0 %v4664_v1 }
 0x419   :  { %4291 = vmatpush3.bf16.msra.mxu1 %v4832_v36  ;;  %3966 = vmatprep.mubr.msk.f32.mxu1 %vm4665_vm14, %v4666_v3 }
 0x41a   :  { %4292 = vmatprep.subr.bf16.mxu1 %v4664_v1 }
 0x41b   :  { %4270 = vmatpush3.bf16.msra.mxu0 %v4839_v41 }
 0x41c   :  { %4271 = vmatprep.subr.bf16.mxu0 %v4664_v1 }
 0x41d   :  { %4294 = vmatpush3.bf16.msra.mxu1 %v4839_v41 }
 0x41e   :  { %4295 = vmatprep.subr.bf16.mxu1 %v4664_v1 }
 0x41f   :  { %4273 = vmatpush3.bf16.msra.mxu0 %v4851_v44 }
 0x420   :  { %4274 = vmatprep.subr.bf16.mxu0 %v4664_v1 }
 0x421   :  { %4297 = vmatpush3.bf16.msra.mxu1 %v4851_v44 }
 0x422   :  { %4298 = vmatprep.subr.bf16.mxu1 %v4664_v1 }
 0x423   :  { %4276 = vmatpush3.bf16.msra.mxu0 %v4857_v48 }
 0x424   :  { %4277 = vmatprep.subr.bf16.mxu0 %v4664_v1 }
 0x425   :  { %4300 = vmatpush3.bf16.msra.mxu1 %v4857_v48 }
 0x426   :  { %4301 = vmatprep.subr.bf16.mxu1 %v4664_v1 }
 0x427   :  { %4279 = vmatpush3.bf16.msra.mxu0 %v4863_v52 }
 0x428   :  { %4280 = vmatprep.subr.bf16.mxu0 %v4664_v1 }
 0x429   :  { %4303 = vmatpush3.bf16.msra.mxu1 %v4863_v52 }
 0x42a   :  { %4304 = vmatprep.subr.bf16.mxu1 %v4664_v1 }
 0x42b   :  { %4282 = vmatpush3.bf16.msra.mxu0 %v4869_v55 }
 0x42c   :  { %4283 = vmatprep.subr.bf16.mxu0 %v4664_v1 }
 0x42d   :  { %4306 = vmatpush3.bf16.msra.mxu1 %v4869_v55 }
 0x42e   :  { %4307 = vmatprep.subr.bf16.mxu1 %v4664_v1 }
 0x42f   :  { %4285 = vmatpush3.bf16.msra.mxu0 %v4875_v58 }
 0x430   :  { %4286 = vmatprep.subr.bf16.mxu0 %v4664_v1 }
 0x431   :  { %4309 = vmatpush3.bf16.msra.mxu1 %v4875_v58 }
 0x432   :  { %4310 = vmatprep.subr.bf16.mxu1 %v4664_v1 }
 0x433   :  { %4288 = vmatpush3.bf16.msra.mxu0 %v4881_v61 }
 0x434   :  { %3581 = vmatprep.subr.bf16.mxu0 %v4499_v0 }
 0x435   :  { %4312 = vmatpush3.bf16.msra.mxu1 %v4881_v61 }
 0x436   :  { %3969 = vmatprep.subr.bf16.mxu1 %v4498_v63 }
 0x4e9   :  { %v1412_v56 = vpop.f32.mrb[16].mxu0 }
 0x4ea   :  { %v3887_v59 = vpop.f32.mrb[17].mxu0  ;;  %3932 = vmatmul.mubr.f32.vlgmr.msra.gmra.mrb[18].mxu0 %v1412_v56 }
 0x4eb   :  { %v1486_v60 = vpop.f32.mrb[16].mxu1  ;;  %3582 = vmatpush3.bf16.msra.mxu0 %v4501_v2 }
 0x4ec   :  { %v3898_v62 = vpop.f32.mrb[17].mxu1  ;;  %3967 = vmatmul.mubr.f32.vlgmr.msra.gmra.mrb[18].mxu1 %v1486_v60  ;;  %3583 = vmatprep.subr.bf16.mxu0 %v4502_v6 }
 0x4ed   :  { %3970 = vmatpush3.bf16.msra.mxu1 %v4498_v63 }
 0x4ee   :  { %3971 = vmatprep.subr.bf16.mxu1 %v4500_v4 }
 0x4ef   :  { %3584 = vmatpush3.bf16.msra.mxu0 %v4504_v8 }
 0x4f0   :  { %3585 = vmatprep.subr.bf16.mxu0 %v4505_v9  ;;  %v4558_v9 = vld [vmem:[#allocation3] sm:$0xff] }
 0x4f1   :  { %3972 = vmatpush3.bf16.msra.mxu1 %v4500_v4 }
 0x4f2   :  { %3973 = vmatprep.subr.bf16.mxu1 %v4503_v7 }
 0x4f3   :  { %3586 = vmatpush3.bf16.msra.mxu0 %v4507_v15  ;;  %v4559_v15 = vld [vmem:[#allocation3 + $0x8] sm:$0xff] }
 0x4f4   :  { %3587 = vmatprep.subr.bf16.mxu0 %v4508_v17 }
 0x4f5   :  { %3974 = vmatpush3.bf16.msra.mxu1 %v4503_v7 }
 0x4f6   :  { %3975 = vmatprep.subr.bf16.mxu1 %v4506_v12 }
 0x4f7   :  { %3588 = vmatpush3.bf16.msra.mxu0 %v4510_v13 }
 0x4f8   :  { %3589 = vmatprep.subr.bf16.mxu0 %v4511_v19 }
 0x4f9   :  { %3976 = vmatpush3.bf16.msra.mxu1 %v4506_v12 }
 0x4fa   :  { %3977 = vmatprep.subr.bf16.mxu1 %v4509_v18 }
 0x4fb   :  { %3590 = vmatpush3.bf16.msra.mxu0 %v4513_v5 }
 0x4fc   :  { %3591 = vmatprep.subr.bf16.mxu0 %v4514_v21 }
 0x4fd   :  { %3978 = vmatpush3.bf16.msra.mxu1 %v4509_v18  ;;  %v4560_v18 = vld [vmem:[#allocation3 + $0x10] sm:$0xff] }
 0x4fe   :  { %3979 = vmatprep.subr.bf16.mxu1 %v4512_v20 }
 0x4ff   :  { %3592 = vmatpush3.bf16.msra.mxu0 %v4516_v14 }
 0x500   :  { %3593 = vmatprep.subr.bf16.mxu0 %v4517_v24 }
 0x501   :  { %3980 = vmatpush3.bf16.msra.mxu1 %v4512_v20 }
 0x502   :  { %3981 = vmatprep.subr.bf16.mxu1 %v4515_v22 }
 0x503   :  { %3594 = vmatpush3.bf16.msra.mxu0 %v4519_v25 }
 0x504   :  { %3595 = vmatprep.subr.bf16.mxu0 %v4520_v26 }
 0x505   :  { %3982 = vmatpush3.bf16.msra.mxu1 %v4515_v22 }
 0x506   :  { %3983 = vmatprep.subr.bf16.mxu1 %v4518_v16 }
 0x507   :  { %3596 = vmatpush3.bf16.msra.mxu0 %v4521_v28 }
 0x508   :  { %4319 = vmatprep.subr.bf16.mxu0 %v4664_v1 }
 0x509   :  { %3984 = vmatpush3.bf16.msra.mxu1 %v4518_v16 }
 0x50a   :  { %4313 = vmatprep.subr.bf16.mxu1 %v4664_v1 }
 0x5bd   :  { %v1556_v11 = vpop.f32.mrb[18].mxu0 }
 0x5be   :  { %v1560_v30 = vmul.f32 0.001953125, %v1556_v11  ;;  %v3933_v32 = vpop.f32.mrb[19].mxu0 }
 0x5bf   :  { %v1627_v33 = vpop.f32.mrb[18].mxu1 }
 0x5c0   :  { %v1632_v34 = vmul.f32 %v1560_v30, %v1560_v30  ;;  %v1631_v35 = vmul.f32 0.001953125, %v1627_v33  ;;  %v3968_v38 = vpop.f32.mrb[19].mxu1 }
 0x5c2   :  { %v1633_v39 = vsub.f32 %v1631_v35, %v1632_v34 }
 0x5c4   :  { %v1634_v42 = vadd.f32 1e-05, %v1633_v39 }
 0x5c6   :  { %4552 = vrsqrt.f32 %v1634_v42 }
 0x5d0   :  { %v4553_v50 = vpop.eup %4552 }
 0x5d1   :  { %v1636_v51 = vmul.f32 %v4553_v50, %v3281_v45 }
 0x5d3   :  { %v1637_v54 = vmul.f32 %v1636_v51, %v1560_v30  ;;  %v1643_v56 = vrot.slane %v1636_v51, %v4893_v57  ;;  %v1771_v51 = vld [vmem:[#allocation2 + $0x8] sm:$0x1] }
 0x5d5   :  { %v1638_v59 = vsub.f32 %v3282_v53, %v1637_v54  ;;  %v1645_v60 = vmul.f32 %v1643_v56, %v4942_v27  ;;  %v1646_v62 = vmul.f32 %v1643_v56, %v4944_v29  ;;  %v1647_v63 = vmul.f32 %v1643_v56, %v4953_v43  ;;  %v4561_v29 = vld [vmem:[#allocation3 + $0x18] sm:$0xff] }
 0x5d6   :  { %v1648_v0 = vmul.f32 %v1643_v56, %v4956_v47 }
 0x5d7   :  { %v1653_v4 = vrot.slane %v1638_v59, %v4893_v57  ;;  %v1774_v59 = vld [vmem:[#allocation2 + $0xc] sm:$0xf] }
 0x5d9   :  { %v1655_v2 = vadd.f32 %v1653_v4, %v1645_v60  ;;  %v1656_v6 = vadd.f32 %v1653_v4, %v1646_v62  ;;  %v1657_v7 = vadd.f32 %v1653_v4, %v1647_v63  ;;  %v1658_v8 = vadd.f32 %v1653_v4, %v1648_v0  ;;  %v1778_v60 = vld [vmem:[#allocation2 + $0x14] sm:$0x1] }
 0x5db   :  { %v5018_v12 = vadd.f32 %v4558_v9, %v1655_v2  ;;  %v5020_v17 = vadd.f32 %v4559_v15, %v1656_v6  ;;  %v5022_v27 = vadd.f32 %v4560_v18, %v1657_v7  ;;  %v5024_v13 = vadd.f32 %v4561_v29, %v1658_v8 }
 0x5dd   :  { %v3409_v43 = vpack.c.bf16 %v5018_v12, %v5018_v12  ;;  %v3410_v47 = vpack.c.bf16 %v5020_v17, %v5020_v17  ;;  %v3411_v19 = vpack.c.bf16 %v5022_v27, %v5022_v27  ;;  %v3412_v20 = vpack.c.bf16 %v5024_v13, %v5024_v13 }
 0x5df   :  { %v1729_v5 = vshrl.u32 %v3409_v43, 16  ;;  %v1737_v21 = vshrl.u32 %v3410_v47, 16  ;;  %v1746_v22 = vshrl.u32 %v3411_v19, 16  ;;  %v1754_v14 = vshrl.u32 %v3412_v20, 16 }
 0x5e0   :  { %v1732_v16 = vshll.u32 %v3409_v43, 16  ;;  %v1740_v26 = vshll.u32 %v3410_v47, 16  ;;  %v1749_v11 = vshll.u32 %v3411_v19, 16  ;;  %v1757_v32 = vshll.u32 %v3412_v20, 16 }
 0x5e1   :  { %v1731_v24 = vrot.slane %v1729_v5, 7  ;;  %v1739_v25 = vrot.slane %v1737_v21, 7  ;;  %v1748_v28 = vrot.slane %v1746_v22, 7  ;;  %v1756_v30 = vrot.slane %v1754_v14, 7 }
 0x5e3   :  { %v1734_v33 = vor.u32 %v1732_v16, %v1731_v24  ;;  %v1735_v34 = vrot.slane %v1731_v24, 4  ;;  %v1742_v35 = vor.u32 %v1740_v26, %v1739_v25  ;;  %v1744_v38 = vrot.slane %v1739_v25, 4 }
 0x5e4   :  { %v1751_v39 = vor.u32 %v1749_v11, %v1748_v28  ;;  %v1752_v42 = vrot.slane %v1748_v28, 4  ;;  %v1759_v45 = vor.u32 %v1757_v32, %v1756_v30  ;;  %v1761_v50 = vrot.slane %v1756_v30, 4 }
 0x5e5   :  { %v1743_v53 = vsel %vm4743_vm5, %v1735_v34, %v1742_v35  ;;  %v1768_v54 = vsel %vm4749_vm6, %v1734_v33, %v4919_v23  ;;  %v1772_v56 = vsel %vm4755_vm7, %v1744_v38, %v1771_v51 }
 0x5e6   :  { %v1760_v62 = vsel %vm4743_vm5, %v1752_v42, %v1759_v45  ;;  %1770 = vst [vmem:[#allocation2 + $0x4] sm:$0xf] %v1743_v53  ;;  %v1775_v63 = vsel %vm4749_vm6, %v1751_v39, %v1774_v59  ;;  %v1779_v0 = vsel %vm4755_vm7, %v1761_v50, %v1778_v60  ;;  %1769 = vst [vmem:[#allocation2] sm:$0xf] %v1768_v54 }
 0x5e7   :  { %1773 = vst [vmem:[#allocation2 + $0x8] sm:$0x1] %v1772_v56  ;;  %1777 = vst [vmem:[#allocation2 + $0x10] sm:$0xf] %v1760_v62 }
 0x5e8   :  { %1776 = vst [vmem:[#allocation2 + $0xc] sm:$0xf] %v1775_v63  ;;  %1780 = vst [vmem:[#allocation2 + $0x14] sm:$0x1] %v1779_v0 }
 0x5ed   :  { %v1782_v23 = vld [vmem:[#allocation2 + $0x4] sm:$0xf]  ;;  %v1835_v2 = vld [vmem:[#allocation2] sm:$0xe] }
 0x5ee   :  { %v1785_v4 = vld [vmem:[#allocation2 + $0x8] sm:$0x1]  ;;  %v3327_v6 = vrot.slane %v1835_v2, 9  ;;  %v1845_v7 = vrot.slane %v1782_v23, 5  ;;  %v1784_v9 = vld [vmem:[#allocation2 + $0x10] sm:$0xf] }
 0x5ef   :  { %v1848_v8 = vrot.slane %v1785_v4, 5  ;;  %v1797_v15 = vshll.u32 %v1782_v23, 16  ;;  %v1786_v18 = vld [vmem:[#allocation2 + $0x14] sm:$0x1]  ;;  %v1836_v29 = vld [vmem:[#allocation2 + $0xc] sm:$0xe] }
 0x5f0   :  { %v1852_v43 = vrot.slane %v1784_v9, 5  ;;  %v1801_v47 = vshrl.u32 %v1782_v23, 16  ;;  %v1846_v19 = vsel %vm4777_vm12, %v3327_v6, %v1845_v7  ;;  %v1847_v20 = vrot.slane %v1845_v7, 4  ;;  %v5049_v22 = vld [vmem:[#allocation2] sm:$0xf] }
 0x5f1   :  { %v3328_v5 = vrot.slane %v1836_v29, 9  ;;  %v1855_v21 = vrot.slane %v1786_v18, 5  ;;  %v1788_v24 = vshrl.u32 %v5049_v22, 16  ;;  %v1791_v16 = vshll.u32 %v5049_v22, 16  ;;  %v1783_v32 = vld [vmem:[#allocation2 + $0xc] sm:$0xf] }
 0x5f2   :  { %v1854_v14 = vrot.slane %v1852_v43, 4  ;;  %v1799_v25 = vrot.slane %v1797_v15, 5  ;;  %v1849_v26 = vsel %vm4777_vm12, %v1847_v20, %v1848_v8  ;;  %v1803_v11 = vrot.slane %v1801_v47, 4 }
 0x5f3   :  { %v1853_v28 = vsel %vm4777_vm12, %v3328_v5, %v1852_v43  ;;  %v1807_v30 = vshll.u32 %v1785_v4, 16  ;;  %v3333_v33 = vcombine.low %v1846_v19, %v1849_v26  ;;  %v1790_v35 = vrot.slane %v1788_v24, 4 }
 0x5f4   :  { %v1856_v34 = vsel %vm4777_vm12, %v1854_v14, %v1855_v21  ;;  %v1793_v38 = vrot.slane %v1791_v16, 5  ;;  %v1804_v42 = vor.u32 %v1803_v11, %v1799_v25  ;;  %v1812_v50 = vshrl.u32 %v1783_v32, 16 }
 0x5f5   :  { %v3334_v39 = vcombine.low %v1853_v28, %v1856_v34  ;;  %3985 = vmatprep.mubr.bf16.mxu1 %v3333_v33  ;;  %v1815_v51 = vshll.u32 %v1783_v32, 16  ;;  %v1821_v53 = vshll.u32 %v1784_v9, 16  ;;  %v1809_v56 = vrot.slane %v1807_v30, 5 }
 0x5f6   :  { %v1794_v45 = vor.u32 %v1793_v38, %v1790_v35  ;;  %v1805_v54 = vrot.slane %v1804_v42, 4  ;;  %v1825_v59 = vshrl.u32 %v1784_v9, 16  ;;  %v1814_v62 = vrot.slane %v1812_v50, 4 }
 0x5f7   :  { %3986 = vmatmul.mubr.bf16.vlgmr.msra.gmra.mrb[20].mxu1 %v3334_v39  ;;  %v1817_v63 = vrot.slane %v1815_v51, 5  ;;  %v1823_v0 = vrot.slane %v1821_v53, 5  ;;  %v1831_v6 = vshll.u32 %v1786_v18, 16  ;;  %v3329_v43 = vcombine.low %v5049_v22, %v1782_v23 }
 0x5f8   :  { %v1795_v60 = vrot.slane %v1794_v45, 4  ;;  %3997 = vmatprep.mubr.msk.f32.mxu1 %vm4665_vm14, %v4666_v3  ;;  %v1810_v4 = vsel %vm4786_vm13, %v1805_v54, %v1809_v56  ;;  %v1827_v2 = vrot.slane %v1825_v59, 4  ;;  %v3330_v14 = vcombine.low %v1783_v32, %v1784_v9 }
 0x5f9   :  { %v1818_v8 = vor.u32 %v1817_v63, %v1814_v62  ;;  %v1833_v20 = vrot.slane %v1831_v6, 5 }
 0x5fa   :  { %v1800_v7 = vsel %vm4786_vm13, %v1795_v60, %v1799_v25  ;;  %v1828_v29 = vor.u32 %v1827_v2, %v1823_v0 }
 0x5fb   :  { %v3331_v15 = vcombine.low %v1800_v7, %v1810_v4  ;;  %v1819_v47 = vrot.slane %v1818_v8, 4 }
 0x5fc   :  { %v1829_v19 = vrot.slane %v1828_v29, 4  ;;  %v4525_v29 = vld [vmem:[#allocation6 + $0x280] sm:$0xff]  }
 0x5fd   :  { %2059 = vmatprep.mubr.bf16.mxu0 %v3331_v15  ;;  %v1824_v5 = vsel %vm4786_vm13, %v1819_v47, %v1823_v0  ;;  %v4524_v15 = vld [vmem:[#allocation6 + $0x2c0] sm:$0xff]  }
 0x5fe   :  { %2060 = vmatmul.mubr.bf16.vlgmr.msra.gmra.mrb[20].mxu0 %v3329_v43  ;;  %v1834_v21 = vsel %vm4786_vm13, %v1829_v19, %v1833_v20  ;;  %v4526_v43 = vld [vmem:[#allocation6 + $0x2c8] sm:$0xff]   ;;  %v4527_v47 = vld [vmem:[#allocation6 + $0x240] sm:$0xff]   ;;  %v4529_v20 = vld [vmem:[#allocation6 + $0x2d0] sm:$0xff]  }
 0x5ff   :  { %v3332_v18 = vcombine.low %v1824_v5, %v1834_v21  ;;  %v4528_v19 = vld [vmem:[#allocation6 + $0x288] sm:$0xff]   ;;  %v4531_v21 = vld [vmem:[#allocation6 + $0x290] sm:$0xff]  }
 0x600   :  { %v4530_v5 = vld [vmem:[#allocation6 + $0x248] sm:$0xff]  }
 0x601   :  { %2067 = vmatprep.mubr.bf16.mxu0 %v3332_v18  ;;  %v4532_v18 = vld [vmem:[#allocation6 + $0x2d8] sm:$0xff]  }
 0x606   :  { %2068 = vmatmul.mubr.bf16.gmra.mrb[24].mxu0 %v3330_v14  ;;  %v4533_v14 = vld [vmem:[#allocation6 + $0x250] sm:$0xff]  }
 0x607   :  { %4008 = vmatprep.mubr.msk.f32.mxu0 %vm4665_vm14, %v4666_v3 }
 0x6ca   :  { %v3987_v24 = vpop.f32.mrb[20].mxu1 }
 0x6cb   :  { %v2110_v23 = vpop.f32.mrb[21].mxu1 }
 0x6cc   :  { %v3988_v16 = vpop.f32.mrb[22].mxu1 }
 0x6cd   :  { %v2113_v25 = vpop.f32.mrb[23].mxu1 }
 0x6d1   :  { %v3597_v26 = vpop.f32.mrb[20].mxu0 }
 0x6d2   :  { %v3598_v28 = vpop.f32.mrb[21].mxu0 }
 0x6d3   :  { %v3599_v11 = vadd.f32 %v3598_v28, %v3597_v26  ;;  %v3600_v30 = vpop.f32.mrb[22].mxu0  ;;  %v4538_v26 = vld [vmem:[#allocation6 + $0x2e8] sm:$0xff]   ;;  %v4539_v28 = vld [vmem:[#allocation6 + $0x260] sm:$0xff]  }
 0x6d4   :  { %v3601_v33 = vpop.f32.mrb[23].mxu0 }
 0x6d5   :  { %v5072_v34 = vadd.f32 %v3599_v11, %v2110_v23  ;;  %v3602_v35 = vadd.f32 %v3601_v33, %v3600_v30  ;;  %v4535_v23 = vld [vmem:[#allocation6 + $0x2e0] sm:$0xff]   ;;  %v4540_v11 = vld [vmem:[#allocation6 + $0x2a8] sm:$0xff]   ;;  %v4541_v30 = vld [vmem:[#allocation6 + $0x2f0] sm:$0xff]  }
 0x6d6   :  { %v4542_v33 = vld [vmem:[#allocation6 + $0x268] sm:$0xff]  }
 0x6d7   :  { %v5074_v38 = vadd.f32 %v3602_v35, %v2113_v25  ;;  %v2195_v9 = vmul.f32 %v5072_v34, %v5072_v34  ;;  %v4537_v25 = vld [vmem:[#allocation6 + $0x2a0] sm:$0xff]   ;;  %v4543_v35 = vld [vmem:[#allocation6 + $0x2b0] sm:$0xff]  }
 0x6d9   :  { %v4314_v32 = vpack.c.bf16 %v5074_v38, %v5072_v34  ;;  %v2196_v39 = vmul.f32 %v5074_v38, %v5074_v38  ;;  %v3603_v42 = vpop.f32.mrb[24].mxu0 }
 0x6da   :  { %v3604_v45 = vpop.f32.mrb[25].mxu0 }
 0x6db   :  { %v3605_v50 = vadd.f32 %v3604_v45, %v3603_v42  ;;  %v3606_v51 = vpop.f32.mrb[26].mxu0  ;;  %4315 = vmatpush3.bf16.msra.mxu1 %v4314_v32  ;;  %v4320_v53 = vpack.c.bf16 %v2196_v39, %v2195_v9  ;;  %v4544_v9 = vld [vmem:[#allocation6 + $0x2f8] sm:$0xff]   ;;  %v4545_v32 = vld [vmem:[#allocation6 + $0x270] sm:$0xff]  }
 0x6dc   :  { %v3607_v54 = vpop.f32.mrb[27].mxu0  ;;  %4316 = vmatprep.subr.bf16.mxu1 %v4664_v1  ;;  %v4546_v39 = vld [vmem:[#allocation6 + $0x2b8] sm:$0xff]  }
 0x6dd   :  { %v5083_v56 = vadd.f32 %v3987_v24, %v3605_v50  ;;  %v3608_v59 = vadd.f32 %v3607_v54, %v3606_v51  ;;  %4321 = vmatpush3.bf16.msra.mxu0 %v4320_v53  ;;  %v4534_v24 = vld [vmem:[#allocation6 + $0x298] sm:$0xff]  }
 0x6de   :  { %4322 = vmatprep.subr.bf16.mxu0 %v4664_v1  ;;  %v4547_v42 = vld [vmem:[#allocation6 + $0x278] sm:$0xff]  }
 0x6df   :  { %v5086_v60 = vadd.f32 %v3988_v16, %v3608_v59  ;;  %v2197_v62 = vmul.f32 %v5083_v56, %v5083_v56  ;;  %v4536_v16 = vld [vmem:[#allocation6 + $0x258] sm:$0xff]  }
 0x6e1   :  { %v4317_v63 = vpack.c.bf16 %v5086_v60, %v5083_v56  ;;  %v2198_v0 = vmul.f32 %v5086_v60, %v5086_v60 }
 0x6e3   :  { %4318 = vmatpush3.bf16.msra.mxu1 %v4317_v63  ;;  %v4323_v4 = vpack.c.bf16 %v2198_v0, %v2197_v62 }
 0x6e4   :  { %4325 = vmatprep.subr.bf16.mxu1 %v4664_v1 }
 0x6e5   :  { %4324 = vmatpush3.bf16.msra.mxu0 %v4323_v4  ;;  %v3321_v4 = vld [vmem:[%s5276_s2 + $0x2] sm:$0x1] }
 0x6e6   :  { %3998 = vmatmul.mubr.msk.f32.vlgmr.msra.gmra.mrb[24].mxu1 %vm563_vm15, %v4667_v40  ;;  %4349 = vmatprep.subr.bf16.mxu0 %v4664_v1 }
 0x6e7   :  { %4327 = vmatpush3.bf16.msra.mxu1 %v4832_v36  ;;  %4043 = vmatprep.mubr.msk.f32.mxu1 %vm4665_vm14, %v4666_v3 }
 0x6e8   :  { %4009 = vmatmul.mubr.msk.f32.vlgmr.msra.gmra.mrb[28].mxu0 %vm563_vm15, %v4667_v40  ;;  %4328 = vmatprep.subr.bf16.mxu1 %v4664_v1 }
 0x6e9   :  { %4351 = vmatpush3.bf16.msra.mxu0 %v4832_v36  ;;  %4078 = vmatprep.mubr.msk.f32.mxu0 %vm4665_vm14, %v4666_v3 }
 0x6ea   :  { %4352 = vmatprep.subr.bf16.mxu0 %v4664_v1 }
 0x6eb   :  { %4330 = vmatpush3.bf16.msra.mxu1 %v4839_v41 }
 0x6ec   :  { %4331 = vmatprep.subr.bf16.mxu1 %v4664_v1 }
 0x6ed   :  { %4354 = vmatpush3.bf16.msra.mxu0 %v4839_v41 }
 0x6ee   :  { %4355 = vmatprep.subr.bf16.mxu0 %v4664_v1 }
 0x6ef   :  { %4333 = vmatpush3.bf16.msra.mxu1 %v4851_v44 }
 0x6f0   :  { %4334 = vmatprep.subr.bf16.mxu1 %v4664_v1 }
 0x6f1   :  { %4357 = vmatpush3.bf16.msra.mxu0 %v4851_v44 }
 0x6f2   :  { %4358 = vmatprep.subr.bf16.mxu0 %v4664_v1 }
 0x6f3   :  { %4336 = vmatpush3.bf16.msra.mxu1 %v4857_v48 }
 0x6f4   :  { %4337 = vmatprep.subr.bf16.mxu1 %v4664_v1 }
 0x6f5   :  { %4360 = vmatpush3.bf16.msra.mxu0 %v4857_v48 }
 0x6f6   :  { %4361 = vmatprep.subr.bf16.mxu0 %v4664_v1 }
 0x6f7   :  { %4339 = vmatpush3.bf16.msra.mxu1 %v4863_v52 }
 0x6f8   :  { %4340 = vmatprep.subr.bf16.mxu1 %v4664_v1 }
 0x6f9   :  { %4363 = vmatpush3.bf16.msra.mxu0 %v4863_v52 }
 0x6fa   :  { %4364 = vmatprep.subr.bf16.mxu0 %v4664_v1 }
 0x6fb   :  { %4342 = vmatpush3.bf16.msra.mxu1 %v4869_v55 }
 0x6fc   :  { %4343 = vmatprep.subr.bf16.mxu1 %v4664_v1 }
 0x6fd   :  { %4366 = vmatpush3.bf16.msra.mxu0 %v4869_v55 }
 0x6fe   :  { %4367 = vmatprep.subr.bf16.mxu0 %v4664_v1 }
 0x6ff   :  { %4345 = vmatpush3.bf16.msra.mxu1 %v4875_v58 }
 0x700   :  { %4346 = vmatprep.subr.bf16.mxu1 %v4664_v1 }
 0x701   :  { %4369 = vmatpush3.bf16.msra.mxu0 %v4875_v58 }
 0x702   :  { %4370 = vmatprep.subr.bf16.mxu0 %v4664_v1 }
 0x703   :  { %4348 = vmatpush3.bf16.msra.mxu1 %v4881_v61 }
 0x704   :  { %3663 = vmatprep.subr.bf16.mxu1 %v4525_v29 }
 0x705   :  { %4372 = vmatpush3.bf16.msra.mxu0 %v4881_v61 }
 0x706   :  { %4081 = vmatprep.subr.bf16.mxu0 %v4524_v15 }
 0x7b9   :  { %v2191_v2 = vpop.f32.mrb[24].mxu1 }
 0x7ba   :  { %v3999_v6 = vpop.f32.mrb[25].mxu1  ;;  %4044 = vmatmul.mubr.f32.vlgmr.msra.gmra.mrb[26].mxu1 %v2191_v2 }
 0x7bb   :  { %v2265_v7 = vpop.f32.mrb[28].mxu0  ;;  %3664 = vmatpush3.bf16.msra.mxu1 %v4527_v47 }
 0x7bc   :  { %v4010_v8 = vpop.f32.mrb[29].mxu0  ;;  %4079 = vmatmul.mubr.f32.vlgmr.msra.gmra.mrb[30].mxu0 %v2265_v7  ;;  %3665 = vmatprep.subr.bf16.mxu1 %v4528_v19  ;;  %v3322_v7 = vld [vmem:[%s5277_s3 + $0x2] sm:$0x1] }
 0x7bd   :  { %4082 = vmatpush3.bf16.msra.mxu0 %v4524_v15 }
 0x7be   :  { %4083 = vmatprep.subr.bf16.mxu0 %v4526_v43 }
 0x7bf   :  { %3666 = vmatpush3.bf16.msra.mxu1 %v4530_v5 }
 0x7c0   :  { %3667 = vmatprep.subr.bf16.mxu1 %v4531_v21 }
 0x7c1   :  { %4084 = vmatpush3.bf16.msra.mxu0 %v4526_v43 }
 0x7c2   :  { %4085 = vmatprep.subr.bf16.mxu0 %v4529_v20 }
 0x7c3   :  { %3668 = vmatpush3.bf16.msra.mxu1 %v4533_v14 }
 0x7c4   :  { %3669 = vmatprep.subr.bf16.mxu1 %v4534_v24 }
 0x7c5   :  { %4086 = vmatpush3.bf16.msra.mxu0 %v4529_v20 }
 0x7c6   :  { %4087 = vmatprep.subr.bf16.mxu0 %v4532_v18 }
 0x7c7   :  { %3670 = vmatpush3.bf16.msra.mxu1 %v4536_v16 }
 0x7c8   :  { %3671 = vmatprep.subr.bf16.mxu1 %v4537_v25 }
 0x7c9   :  { %4088 = vmatpush3.bf16.msra.mxu0 %v4532_v18 }
 0x7ca   :  { %4089 = vmatprep.subr.bf16.mxu0 %v4535_v23 }
 0x7cb   :  { %3672 = vmatpush3.bf16.msra.mxu1 %v4539_v28 }
 0x7cc   :  { %3673 = vmatprep.subr.bf16.mxu1 %v4540_v11 }
 0x7cd   :  { %4090 = vmatpush3.bf16.msra.mxu0 %v4535_v23 }
 0x7ce   :  { %4091 = vmatprep.subr.bf16.mxu0 %v4538_v26 }
 0x7cf   :  { %3674 = vmatpush3.bf16.msra.mxu1 %v4542_v33 }
 0x7d0   :  { %3675 = vmatprep.subr.bf16.mxu1 %v4543_v35 }
 0x7d1   :  { %4092 = vmatpush3.bf16.msra.mxu0 %v4538_v26 }
 0x7d2   :  { %4093 = vmatprep.subr.bf16.mxu0 %v4541_v30 }
 0x7d3   :  { %3676 = vmatpush3.bf16.msra.mxu1 %v4545_v32 }
 0x7d4   :  { %3677 = vmatprep.subr.bf16.mxu1 %v4546_v39 }
 0x7d5   :  { %4094 = vmatpush3.bf16.msra.mxu0 %v4541_v30 }
 0x7d6   :  { %4095 = vmatprep.subr.bf16.mxu0 %v4544_v9 }
 0x7d7   :  { %3678 = vmatpush3.bf16.msra.mxu1 %v4547_v42 }
 0x7d8   :  { %4379 = vmatprep.subr.bf16.mxu1 %v4664_v1 }
 0x7d9   :  { %4096 = vmatpush3.bf16.msra.mxu0 %v4544_v9 }
 0x7da   :  { %4373 = vmatprep.subr.bf16.mxu0 %v4664_v1 }
 0x88d   :  { %v2335_v45 = vpop.f32.mrb[26].mxu1 }
 0x88e   :  { %v2339_v50 = vmul.f32 0.001953125, %v2335_v45  ;;  %v4045_v51 = vpop.f32.mrb[27].mxu1 }
 0x88f   :  { %v2406_v53 = vpop.f32.mrb[30].mxu0 }
 0x890   :  { %v2411_v54 = vmul.f32 %v2339_v50, %v2339_v50  ;;  %v2410_v59 = vmul.f32 0.001953125, %v2406_v53  ;;  %v4080_v62 = vpop.f32.mrb[31].mxu0 }
 0x892   :  { %v2412_v63 = vsub.f32 %v2410_v59, %v2411_v54 }
 0x894   :  { %v2413_v0 = vadd.f32 1e-05, %v2412_v63 }
 0x896   :  { %4554 = vrsqrt.f32 %v2413_v0 }
 0x8a0   :  { %v4555_v2 = vpop.eup %4554 }
 0x8a1   :  { %v2415_v6 = vmul.f32 %v4555_v2, %v3321_v4 }
 0x8a3   :  { %v2416_v8 = vmul.f32 %v2415_v6, %v2339_v50  ;;  %v2422_v15 = vrot.slane %v2415_v6, %v4893_v57  ;;  %v2550_v6 = vld [vmem:[#allocation2 + $0x8] sm:$0x1] }
 0x8a5   :  { %v2417_v29 = vsub.f32 %v3322_v7, %v2416_v8  ;;  %v2424_v43 = vmul.f32 %v2422_v15, %v5072_v34  ;;  %v2425_v47 = vmul.f32 %v2422_v15, %v5074_v38  ;;  %v2426_v19 = vmul.f32 %v2422_v15, %v5083_v56 }
 0x8a6   :  { %v2427_v20 = vmul.f32 %v2422_v15, %v5086_v60 }
 0x8a7   :  { %v2432_v5 = vrot.slane %v2417_v29, %v4893_v57  ;;  %v2553_v29 = vld [vmem:[#allocation2 + $0xc] sm:$0xf] }
 0x8a9   :  { %v2434_v21 = vadd.f32 %v2432_v5, %v2424_v43  ;;  %v2435_v18 = vadd.f32 %v2432_v5, %v2425_v47  ;;  %v2436_v14 = vadd.f32 %v2432_v5, %v2426_v19  ;;  %v2437_v24 = vadd.f32 %v2432_v5, %v2427_v20  ;;  %v2557_v43 = vld [vmem:[#allocation2 + $0x14] sm:$0x1] }
 0x8ab   :  { %v2438_v23 = vmax.f32 %v2434_v21, 0.0  ;;  %v2439_v16 = vmax.f32 %v2435_v18, 0.0  ;;  %v2440_v25 = vmax.f32 %v2436_v14, 0.0  ;;  %v2441_v26 = vmax.f32 %v2437_v24, 0.0 }
 0x8ad   :  { %v3413_v28 = vpack.c.bf16 %v2438_v23, %v2438_v23  ;;  %v3414_v11 = vpack.c.bf16 %v2439_v16, %v2439_v16  ;;  %v3415_v30 = vpack.c.bf16 %v2440_v25, %v2440_v25  ;;  %v3416_v34 = vpack.c.bf16 %v2441_v26, %v2441_v26 }
 0x8af   :  { %v2508_v33 = vshrl.u32 %v3413_v28, 16  ;;  %v2516_v38 = vshrl.u32 %v3414_v11, 16  ;;  %v2525_v35 = vshrl.u32 %v3415_v30, 16  ;;  %v2533_v56 = vshrl.u32 %v3416_v34, 16 }
 0x8b0   :  { %v2511_v60 = vshll.u32 %v3413_v28, 16  ;;  %v2519_v39 = vshll.u32 %v3414_v11, 16  ;;  %v2528_v45 = vshll.u32 %v3415_v30, 16  ;;  %v2536_v51 = vshll.u32 %v3416_v34, 16 }
 0x8b1   :  { %v2510_v9 = vrot.slane %v2508_v33, 7  ;;  %v2518_v32 = vrot.slane %v2516_v38, 7  ;;  %v2527_v42 = vrot.slane %v2525_v35, 7  ;;  %v2535_v50 = vrot.slane %v2533_v56, 7 }
 0x8b3   :  { %v2513_v53 = vor.u32 %v2511_v60, %v2510_v9  ;;  %v2514_v54 = vrot.slane %v2510_v9, 4  ;;  %v2521_v59 = vor.u32 %v2519_v39, %v2518_v32  ;;  %v2523_v62 = vrot.slane %v2518_v32, 4 }
 0x8b4   :  { %v2530_v63 = vor.u32 %v2528_v45, %v2527_v42  ;;  %v2531_v0 = vrot.slane %v2527_v42, 4  ;;  %v2538_v4 = vor.u32 %v2536_v51, %v2535_v50  ;;  %v2540_v2 = vrot.slane %v2535_v50, 4 }
 0x8b5   :  { %v2522_v7 = vsel %vm4743_vm5, %v2514_v54, %v2521_v59  ;;  %v2547_v8 = vsel %vm4749_vm6, %v2513_v53, %v5049_v22  ;;  %v2551_v15 = vsel %vm4755_vm7, %v2523_v62, %v2550_v6 }
 0x8b6   :  { %v2539_v47 = vsel %vm4743_vm5, %v2531_v0, %v2538_v4  ;;  %2549 = vst [vmem:[#allocation2 + $0x4] sm:$0xf] %v2522_v7  ;;  %v2554_v19 = vsel %vm4749_vm6, %v2530_v63, %v2553_v29  ;;  %v2558_v20 = vsel %vm4755_vm7, %v2540_v2, %v2557_v43  ;;  %2548 = vst [vmem:[#allocation2] sm:$0xf] %v2547_v8 }
 0x8b7   :  { %2552 = vst [vmem:[#allocation2 + $0x8] sm:$0x1] %v2551_v15  ;;  %2556 = vst [vmem:[#allocation2 + $0x10] sm:$0xf] %v2539_v47 }
 0x8b8   :  { %2555 = vst [vmem:[#allocation2 + $0xc] sm:$0xf] %v2554_v19  ;;  %2559 = vst [vmem:[#allocation2 + $0x14] sm:$0x1] %v2558_v20 }
 0x8bd   :  { %v2561_v22 = vld [vmem:[#allocation2 + $0x4] sm:$0xf]  ;;  %v2614_v21 = vld [vmem:[#allocation2] sm:$0xe] }
 0x8be   :  { %v2564_v5 = vld [vmem:[#allocation2 + $0x8] sm:$0x1]  ;;  %v3367_v18 = vrot.slane %v2614_v21, 9  ;;  %v2624_v14 = vrot.slane %v2561_v22, 5  ;;  %v2563_v37 = vld [vmem:[#allocation2 + $0x10] sm:$0xf] }
 0x8bf   :  { %v2627_v24 = vrot.slane %v2564_v5, 5  ;;  %v2576_v23 = vshll.u32 %v2561_v22, 16  ;;  %v2565_v16 = vld [vmem:[#allocation2 + $0x14] sm:$0x1]  ;;  %v2615_v25 = vld [vmem:[#allocation2 + $0xc] sm:$0xe] }
 0x8c0   :  { %v2631_v46 = vrot.slane %v2563_v37, 5  ;;  %v2580_v26 = vshrl.u32 %v2561_v22, 16  ;;  %v2625_v49 = vsel %vm4777_vm12, %v3367_v18, %v2624_v14  ;;  %v2626_v28 = vrot.slane %v2624_v14, 4  ;;  %v2560_v34 = vld [vmem:[#allocation2] sm:$0xf] }
 0x8c1   :  { %v3368_v11 = vrot.slane %v2615_v25, 9  ;;  %v2634_v30 = vrot.slane %v2565_v16, 5  ;;  %v2567_v38 = vshrl.u32 %v2560_v34, 16  ;;  %v2570_v35 = vshll.u32 %v2560_v34, 16  ;;  %v2562_v42 = vld [vmem:[#allocation2 + $0xc] sm:$0xf] }
 0x8c2   :  { %v2633_v33 = vrot.slane %v2631_v46, 4  ;;  %v2578_v56 = vrot.slane %v2576_v23, 5  ;;  %v2628_v9 = vsel %vm4777_vm12, %v2626_v28, %v2627_v24  ;;  %v2582_v32 = vrot.slane %v2580_v26, 4 }
 0x8c3   :  { %v2632_v60 = vsel %vm4777_vm12, %v3368_v11, %v2631_v46  ;;  %v2586_v39 = vshll.u32 %v2564_v5, 16  ;;  %v3373_v45 = vcombine.low %v2625_v49, %v2628_v9  ;;  %v2569_v51 = vrot.slane %v2567_v38, 4 }
 0x8c4   :  { %v2635_v50 = vsel %vm4777_vm12, %v2633_v33, %v2634_v30  ;;  %v2572_v53 = vrot.slane %v2570_v35, 5  ;;  %v2583_v59 = vor.u32 %v2582_v32, %v2578_v56  ;;  %v2591_v63 = vshrl.u32 %v2562_v42, 16 }
 0x8c5   :  { %v3374_v54 = vcombine.low %v2632_v60, %v2635_v50  ;;  %4097 = vmatprep.mubr.bf16.mxu0 %v3373_v45  ;;  %v2594_v0 = vshll.u32 %v2562_v42, 16  ;;  %v2600_v4 = vshll.u32 %v2563_v37, 16  ;;  %v2588_v6 = vrot.slane %v2586_v39, 5 }
 0x8c6   :  { %v2573_v62 = vor.u32 %v2572_v53, %v2569_v51  ;;  %v2584_v2 = vrot.slane %v2583_v59, 4  ;;  %v2604_v7 = vshrl.u32 %v2563_v37, 16  ;;  %v2593_v15 = vrot.slane %v2591_v63, 4 }
 0x8c7   :  { %4098 = vmatmul.mubr.bf16.vlgmr.msra.gmra.mrb[32].mxu0 %v3374_v54  ;;  %v2596_v29 = vrot.slane %v2594_v0, 5  ;;  %v2602_v43 = vrot.slane %v2600_v4, 5  ;;  %v2610_v19 = vshll.u32 %v2565_v16, 16  ;;  %v3369_v14 = vcombine.low %v2560_v34, %v2561_v22 }
 0x8c8   :  { %v2574_v8 = vrot.slane %v2573_v62, 4  ;;  %4109 = vmatprep.mubr.msk.f32.mxu0 %vm4665_vm14, %v4666_v3  ;;  %v2589_v10 = vsel %vm4786_vm13, %v2584_v2, %v2588_v6  ;;  %v2606_v47 = vrot.slane %v2604_v7, 4  ;;  %v3370_v16 = vcombine.low %v2562_v42, %v2563_v37 }
 0x8c9   :  { %v2597_v5 = vor.u32 %v2596_v29, %v2593_v15  ;;  %v2612_v25 = vrot.slane %v2610_v19, 5 }
 0x8ca   :  { %v2579_v20 = vsel %vm4786_vm13, %v2574_v8, %v2578_v56  ;;  %v2607_v18 = vor.u32 %v2606_v47, %v2602_v43 }
 0x8cb   :  { %v3371_v21 = vcombine.low %v2579_v20, %v2589_v10  ;;  %v2598_v24 = vrot.slane %v2597_v5, 4  ;;  %v3362_v10 = vld [vmem:[%s5277_s3 + $0x3] sm:$0x1] }
 0x8cc   :  { %v2608_v23 = vrot.slane %v2607_v18, 4 }
 0x8cd   :  { %2838 = vmatprep.mubr.bf16.mxu1 %v3371_v21  ;;  %v2603_v46 = vsel %vm4786_vm13, %v2598_v24, %v2602_v43 }
 0x8ce   :  { %2839 = vmatmul.mubr.bf16.vlgmr.msra.gmra.mrb[28].mxu1 %v3369_v14  ;;  %v2613_v26 = vsel %vm4786_vm13, %v2608_v23, %v2612_v25 }
 0x8cf   :  { %v3372_v49 = vcombine.low %v2603_v46, %v2613_v26 }
 0x8d1   :  { %2846 = vmatprep.mubr.bf16.mxu1 %v3372_v49 }
 0x8d6   :  { %2847 = vmatmul.mubr.bf16.gmra.mrb[32].mxu1 %v3370_v16 }
 0x8d7   :  { %4120 = vmatprep.mubr.msk.f32.mxu1 %vm4665_vm14, %v4666_v3 }
 0x99a   :  { %v4099_v28 = vpop.f32.mrb[32].mxu0 }
 0x99b   :  { %v2889_v22 = vpop.f32.mrb[33].mxu0 }
 0x99c   :  { %v4100_v11 = vpop.f32.mrb[34].mxu0 }
 0x99d   :  { %v2892_v30 = vpop.f32.mrb[35].mxu0 }
 0x9a1   :  { %v3679_v34 = vpop.f32.mrb[28].mxu1 }
 0x9a2   :  { %v3680_v33 = vpop.f32.mrb[29].mxu1 }
 0x9a3   :  { %v3681_v38 = vadd.f32 %v3680_v33, %v3679_v34  ;;  %v3682_v35 = vpop.f32.mrb[30].mxu1 }
 0x9a4   :  { %v3683_v56 = vpop.f32.mrb[31].mxu1 }
 0x9a5   :  { %v5181_v9 = vadd.f32 %v3681_v38, %v2889_v22  ;;  %v3684_v31 = vadd.f32 %v3683_v56, %v3682_v35 }
 0x9a7   :  { %v5183_v60 = vadd.f32 %v3684_v31, %v2892_v30  ;;  %v2974_v37 = vmul.f32 %v5181_v9, %v5181_v9 }
 0x9a9   :  { %v4374_v32 = vpack.c.bf16 %v5183_v60, %v5181_v9  ;;  %v2975_v39 = vmul.f32 %v5183_v60, %v5183_v60  ;;  %v3685_v42 = vpop.f32.mrb[32].mxu1 }
 0x9aa   :  { %v3686_v45 = vpop.f32.mrb[33].mxu1 }
 0x9ab   :  { %v3687_v50 = vadd.f32 %v3686_v45, %v3685_v42  ;;  %v3688_v51 = vpop.f32.mrb[34].mxu1  ;;  %4375 = vmatpush3.bf16.msra.mxu0 %v4374_v32  ;;  %v4380_v53 = vpack.c.bf16 %v2975_v39, %v2974_v37 }
 0x9ac   :  { %v3689_v54 = vpop.f32.mrb[35].mxu1  ;;  %4376 = vmatprep.subr.bf16.mxu0 %v4664_v1 }
 0x9ad   :  { %v5192_v59 = vadd.f32 %v4099_v28, %v3687_v50  ;;  %v3690_v62 = vadd.f32 %v3689_v54, %v3688_v51  ;;  %4381 = vmatpush3.bf16.msra.mxu1 %v4380_v53 }
 0x9ae   :  { %4382 = vmatprep.subr.bf16.mxu1 %v4664_v1 }
 0x9af   :  { %v5195_v63 = vadd.f32 %v4100_v11, %v3690_v62  ;;  %v2976_v0 = vmul.f32 %v5192_v59, %v5192_v59 }
 0x9b1   :  { %v4377_v4 = vpack.c.bf16 %v5195_v63, %v5192_v59  ;;  %v2977_v2 = vmul.f32 %v5195_v63, %v5195_v63 }
 0x9b3   :  { %4378 = vmatpush3.bf16.msra.mxu0 %v4377_v4  ;;  %v4383_v6 = vpack.c.bf16 %v2977_v2, %v2976_v0 }
 0x9b4   :  { %4385 = vmatprep.subr.bf16.mxu0 %v4664_v1 }
 0x9b5   :  { %4384 = vmatpush3.bf16.msra.mxu1 %v4383_v6 }
 0x9b6   :  { %4110 = vmatmul.mubr.msk.f32.vlgmr.msra.gmra.mrb[36].mxu0 %vm563_vm15, %v4667_v40  ;;  %4409 = vmatprep.subr.bf16.mxu1 %v4664_v1 }
 0x9b7   :  { %4387 = vmatpush3.bf16.msra.mxu0 %v4832_v36  ;;  %4155 = vmatprep.mubr.msk.f32.mxu0 %vm4665_vm14, %v4666_v3 }
 0x9b8   :  { %4121 = vmatmul.mubr.msk.f32.vlgmr.msra.gmra.mrb[36].mxu1 %vm563_vm15, %v4667_v40  ;;  %4388 = vmatprep.subr.bf16.mxu0 %v4664_v1 }
 0x9b9   :  { %4411 = vmatpush3.bf16.msra.mxu1 %v4832_v36  ;;  %4190 = vmatprep.mubr.msk.f32.mxu1 %vm4665_vm14, %v4666_v3 }
 0x9ba   :  { %4412 = vmatprep.subr.bf16.mxu1 %v4664_v1 }
 0x9bb   :  { %4390 = vmatpush3.bf16.msra.mxu0 %v4839_v41 }
 0x9bc   :  { %4391 = vmatprep.subr.bf16.mxu0 %v4664_v1 }
 0x9bd   :  { %4414 = vmatpush3.bf16.msra.mxu1 %v4839_v41 }
 0x9be   :  { %4415 = vmatprep.subr.bf16.mxu1 %v4664_v1 }
 0x9bf   :  { %4393 = vmatpush3.bf16.msra.mxu0 %v4851_v44 }
 0x9c0   :  { %4394 = vmatprep.subr.bf16.mxu0 %v4664_v1 }
 0x9c1   :  { %4417 = vmatpush3.bf16.msra.mxu1 %v4851_v44 }
 0x9c2   :  { %4418 = vmatprep.subr.bf16.mxu1 %v4664_v1 }
 0x9c3   :  { %4396 = vmatpush3.bf16.msra.mxu0 %v4857_v48 }
 0x9c4   :  { %4397 = vmatprep.subr.bf16.mxu0 %v4664_v1 }
 0x9c5   :  { %4420 = vmatpush3.bf16.msra.mxu1 %v4857_v48 }
 0x9c6   :  { %4421 = vmatprep.subr.bf16.mxu1 %v4664_v1 }
 0x9c7   :  { %4399 = vmatpush3.bf16.msra.mxu0 %v4863_v52 }
 0x9c8   :  { %4400 = vmatprep.subr.bf16.mxu0 %v4664_v1 }
 0x9c9   :  { %4423 = vmatpush3.bf16.msra.mxu1 %v4863_v52 }
 0x9ca   :  { %4424 = vmatprep.subr.bf16.mxu1 %v4664_v1 }
 0x9cb   :  { %4402 = vmatpush3.bf16.msra.mxu0 %v4869_v55 }
 0x9cc   :  { %4403 = vmatprep.subr.bf16.mxu0 %v4664_v1 }
 0x9cd   :  { %4426 = vmatpush3.bf16.msra.mxu1 %v4869_v55 }
 0x9ce   :  { %4427 = vmatprep.subr.bf16.mxu1 %v4664_v1 }
 0x9cf   :  { %4405 = vmatpush3.bf16.msra.mxu0 %v4875_v58 }
 0x9d0   :  { %4406 = vmatprep.subr.bf16.mxu0 %v4664_v1 }
 0x9d1   :  { %4429 = vmatpush3.bf16.msra.mxu1 %v4875_v58 }
 0x9d2   :  { %4430 = vmatprep.subr.bf16.mxu1 %v4664_v1  ;;  %v3361_v1 = vld [vmem:[%s5276_s2 + $0x3] sm:$0x1]  ;;  %s4668_s2 = smov [#allocation9]  }
 0x9d3   :  { %4408 = vmatpush3.bf16.msra.mxu0 %v4881_v61  ;;  %s3230_s22 = sshll.u32 %s4668_s2, 4  ;;  %s3231_s22 = int_to_ptr.vmem [resolvable:$true] %s3230_s22 }
 0x9d4   :  { %s4628_s3 = scalar_lea.vmem %s3231_s22, 512  ;;  %p4633_p11 = scmp.lt.s32.totalorder %s3231_s22, %s3231_s22 }
 0x9d5   :  { %4432 = vmatpush3.bf16.msra.mxu1 %v4881_v61  ;;  %p4629_p10 = scmp.ne.s32.totalorder %s3231_s22, %s4628_s3  ;;  %p4634_p12 = scmp.lt.s32.totalorder %s4628_s3, %s4628_s3 }
 0x9d7   :  { %p4635_p13 = por %p4634_p12, %p4633_p11 }
 0x9d9   :  { %p4636_p0 = pnand %p4635_p13, %p4629_p10 }
 0xa89   :  { %v2970_v3 = vpop.f32.mrb[36].mxu0 }
 0xa8a   :  { %4156 = vmatmul.mubr.f32.vlgmr.msra.gmra.mrb[38].mxu0 %v2970_v3  ;;  %v4111_v36 = vpop.f32.mrb[37].mxu0 }
 0xa8b   :  { %v3044_v40 = vpop.f32.mrb[36].mxu1 }
 0xa8c   :  { %4191 = vmatmul.mubr.f32.vlgmr.msra.gmra.mrb[38].mxu1 %v3044_v40  ;;  %v4122_v41 = vpop.f32.mrb[37].mxu1 }
 0xb5d   :  { %v3114_v44 = vpop.f32.mrb[38].mxu0 }
 0xb5e   :  { %v3118_v48 = vmul.f32 0.001953125, %v3114_v44  ;;  %v4157_v52 = vpop.f32.mrb[39].mxu0 }
 0xb5f   :  { %v3185_v55 = vpop.f32.mrb[38].mxu1 }
 0xb60   :  { %v3190_v7 = vmul.f32 %v3118_v48, %v3118_v48  ;;  %v3189_v8 = vmul.f32 0.001953125, %v3185_v55  ;;  %v4192_v15 = vpop.f32.mrb[39].mxu1 }
 0xb62   :  { %v3191_v58 = vsub.f32 %v3189_v8, %v3190_v7 }
 0xb64   :  { %v3192_v29 = vadd.f32 1e-05, %v3191_v58 }
 0xb66   :  { %4556 = vrsqrt.f32 %v3192_v29 }
 0xb70   :  { %v4557_v61 = vpop.eup %4556 }
 0xb71   :  { %v3194_v43 = vmul.f32 %v4557_v61, %v3361_v1 }
 0xb73   :  { %v3195_v47 = vmul.f32 %v3194_v43, %v3118_v48  ;;  %v3201_v19 = vrot.slane %v3194_v43, %v4893_v57 }
 0xb75   :  { %v3196_v20 = vsub.f32 %v3362_v10, %v3195_v47  ;;  %v3203_v5 = vmul.f32 %v3201_v19, %v5181_v9  ;;  %v3204_v21 = vmul.f32 %v3201_v19, %v5183_v60  ;;  %v3205_v18 = vmul.f32 %v3201_v19, %v5192_v59 }
 0xb76   :  { %v3206_v14 = vmul.f32 %v3201_v19, %v5195_v63 }
 0xb77   :  { %v3211_v24 = vrot.slane %v3196_v20, %v4893_v57 }
 0xb79   :  { %v3213_v23 = vadd.f32 %v3211_v24, %v3203_v5  ;;  %v3214_v25 = vadd.f32 %v3211_v24, %v3204_v21  ;;  %v3215_v46 = vadd.f32 %v3211_v24, %v3205_v18  ;;  %v3216_v26 = vadd.f32 %v3211_v24, %v3206_v14 }
 0xb7b   :  { %v3217_v49 = vadd.f32 %v3213_v23, %v5018_v12  ;;  %v3218_v16 = vadd.f32 %v3214_v25, %v5020_v17  ;;  %v3219_v28 = vadd.f32 %v3215_v46, %v5022_v27  ;;  %v3220_v22 = vadd.f32 %v3216_v26, %v5024_v13 }
 0xb7d   :  { %3221 = vst [vmem:[#allocation9] sm:$0xff] %v3217_v49  ;;  %3222 = vst [vmem:[#allocation9 + $0x8] sm:$0xff] %v3218_v16 }
 0xb7e   :  { %3223 = vst [vmem:[#allocation9 + $0x10] sm:$0xff] %v3219_v28  ;;  %3224 = vst [vmem:[#allocation9 + $0x18] sm:$0xff] %v3220_v22 }
 0xb7f   :  { %4639 = shalt.err (!%p4636_p0)
}
 0xb80   :  { %s4640_s25 = scalar_lea.hbm %s5279_s5, 512 }
 0xb81   :  { %p4641_p1 = scmp.ne.s32.totalorder %s5279_s5, %s4640_s25  ;;  %p4644_p2 = scmp.lt.u32.totalorder %s4640_s25, %s5279_s5 }
 0xb83   :  { %p4646_p3 = pnand %p4644_p2, %p4641_p1 }
 0xb85   :  { %4649 = shalt.err (!%p4646_p3)
}
 0xb86   :  { %3236 = dma.vmem_to_hbm [thread:$0]  %s3231_s22, 512, %s5279_s5, [#allocation5], %s4660_s1, %s4660_s1, %s4661_s17  }
 0xb87   :  { %4654 = dma.done.wait [#allocation5], 512  }
 0xb88   :  { %4655 = vsyncadd [#allocation5], 4294966784 }
 0xb89   :  { %3240 = vsyncpa [#allocation4], 1 }
 0xb8a   :  { %3241 = vsyncpa [#allocation7], 1 }
 0xb8b   :  { %3242 = vsyncpa [#allocation5], 1 }

</bundles_post_ra>
